<compile_context>
chip_gen: v6e
topology: v6e:2x2x1
jax: 0.10.0
libtpu: 0.0.40
codegen_flags: <defaults>
</compile_context>

<pallas_src>
import jax
import jax.numpy as jnp
from jax import lax
from jax.experimental import pallas as pl
from jax.experimental.pallas import tpu as pltpu


def _sigmoid(z):
    # exact logistic: exp rides the EUP; exact divide keeps the bf16-matmul
    # recurrence from compounding an approx-reciprocal error over S steps.
    return 1.0 / (1.0 + jnp.exp(-z))


def tgcn_kernel(gxr_ref, gxu_ref, gxc_ref, wr_ref, wu_ref, wc_ref, out_ref):
    """Full S-step GRU recurrence for one batch block.

    gxr/gxu/gxc_ref : (S, BB, NH) bf16  precomputed input projection + bias
                      for the r gate, u gate and candidate.
    wr/wu/wc_ref    : (NH, NH)    bf16  fused (graph-conv x linear) recurrent
                      weights for r / u / candidate (state path).
    out_ref         : (S, BB, NH) f32   per-step hidden states.
    """
    S, BB, NH = out_ref.shape
    f32 = jnp.float32
    bf16 = jnp.bfloat16

    def step(s, state):
        state_b = state.astype(bf16)
        # Two independent MXU matmuls on the same LHS: the u-half can still be
        # in the MXU pipeline while the r-path (EUP sigmoid, VPU mul) and the
        # candidate matmul start.
        hr = jnp.dot(state_b, wr_ref[...], preferred_element_type=f32)
        hu = jnp.dot(state_b, wu_ref[...], preferred_element_type=f32)
        r = _sigmoid(gxr_ref[s].astype(f32) + hr)
        hc = jnp.dot((r * state).astype(bf16), wc_ref[...],
                     preferred_element_type=f32)
        u = _sigmoid(gxu_ref[s].astype(f32) + hu)
        cand = jnp.tanh(gxc_ref[s].astype(f32) + hc)
        new_h = u * state + (1.0 - u) * cand
        out_ref[s] = new_h
        return new_h

    # S is small and static: fully-unrolled fori_loop keeps the GRU state in
    # vregs (no per-step VMEM round trip of the state).
    lax.fori_loop(0, S, step, jnp.zeros((BB, NH), f32), unroll=True)


def _pick_batch_block(b_pad8):
    """Grow the batch block toward 128 but keep >=2 grid blocks when possible
    (so the 'parallel' axis can feed a second TensorCore on v7x)."""
    bb = min(128, b_pad8)
    if b_pad8 // bb < 2 and b_pad8 >= 16:
        bb = max(8, ((b_pad8 // 2) // 8) * 8)
    return bb


def tgcn_pallas(x, L_sym, Wg, bg, Wc, bc, H, *, batch_block=None):
    """x: (B, S, N) float32. Wg: (2H, H+1), Wc: (H, H+1) (nn.Linear layout).

    Returns (S, B, N*H) float32 hidden states (one per timestep).
    """
    B, S, N = x.shape
    NH = N * H
    f32 = jnp.float32
    bf16 = jnp.bfloat16
    hp = 'highest'

    eye_n = jnp.eye(N, dtype=f32)
    eye_h = jnp.eye(H, dtype=f32)
    L = L_sym.astype(f32)

    # graph conv of the flat (B, N*H) state over nodes == state @ kron(L^T, I_H)
    KL = jnp.kron(L.T, eye_h)                                       # (NH, NH)

    Wg_t = Wg.T.astype(f32)                                         # (H+1, 2H)
    Wc_t = Wc.T.astype(f32)                                         # (H+1, H)

    # state-side per-node linear, lifted block-diagonal, then fused with the
    # graph conv -> per-step recurrence is plain matmuls on the flat state.
    KWgh = jnp.kron(eye_n, Wg_t[1:])                                # (NH, 2NH)
    KWch = jnp.kron(eye_n, Wc_t[1:])                                # (NH,  NH)
    KLWgh = jnp.matmul(KL, KWgh, precision=hp)                      # (NH, 2NH)
    KLWch = jnp.matmul(KL, KWch, precision=hp)                      # (NH,  NH)

    # Split the fused gate weight into r / u column halves (same columns the
    # flattened torch .split(N*H) selects) and cast to bf16 for the MXU.
    W_r = KLWgh[:, :NH].astype(bf16)                                # (NH, NH)
    W_u = KLWgh[:, NH:].astype(bf16)                                # (NH, NH)
    W_c = KLWch.astype(bf16)                                        # (NH, NH)

    # Hoisted non-recurrent input path.  The input-column weight kron(I_N, w)
    # is block-diagonal, so the projection is a broadcasted outer product.
    gx = jnp.einsum('bsm,nm->sbn', x.astype(f32), L, precision=hp)  # (S, B, N)
    gxg = gx[..., None] * Wg_t[0][None, None, None, :]              # (S,B,N,2H)
    gxc = gx[..., None] * Wc_t[0][None, None, None, :]              # (S,B,N, H)
    GXg = (gxg + bg.astype(f32).reshape(1, 1, 1, 2 * H)).reshape(S, B, 2 * NH)
    GXc = (gxc + bc.astype(f32).reshape(1, 1, 1, H)).reshape(S, B, NH)
    GXr = GXg[:, :, :NH]                                            # (S,B,NH)
    GXu = GXg[:, :, NH:]                                            # (S,B,NH)

    # Pad batch to a multiple of the (auto-picked) batch block; padded rows are
    # benign (sliced off at the end, no NaN risk through sigmoid/tanh).
    if batch_block is None:
        batch_block = _pick_batch_block(((B + 7) // 8) * 8)
    BB = batch_block
    B_pad = ((B + BB - 1) // BB) * BB
    if B_pad != B:
        pad = ((0, 0), (0, B_pad - B), (0, 0))
        GXr = jnp.pad(GXr, pad)
        GXu = jnp.pad(GXu, pad)
        GXc = jnp.pad(GXc, pad)

    # Stream the precomputed input path in bf16 (halves HBM + VMEM traffic);
    # it is upcast to f32 at the point of use inside the kernel.
    GXr = GXr.astype(bf16)
    GXu = GXu.astype(bf16)
    GXc = GXc.astype(bf16)

    grid_spec = pltpu.PrefetchScalarGridSpec(
        num_scalar_prefetch=0,
        grid=(B_pad // BB,),
        in_specs=[
            pl.BlockSpec((S, BB, NH), lambda b: (0, b, 0)),          # GXr block
            pl.BlockSpec((S, BB, NH), lambda b: (0, b, 0)),          # GXu block
            pl.BlockSpec((S, BB, NH), lambda b: (0, b, 0)),          # GXc block
            # grid-invariant fused weights: whole array, single VMEM buffer
            pl.BlockSpec(memory_space=pltpu.MemorySpace.VMEM),       # W_r
            pl.BlockSpec(memory_space=pltpu.MemorySpace.VMEM),       # W_u
            pl.BlockSpec(memory_space=pltpu.MemorySpace.VMEM),       # W_c
        ],
        out_specs=pl.BlockSpec((S, BB, NH), lambda b: (0, b, 0)),
    )

    out = pl.pallas_call(
        tgcn_kernel,
        out_shape=jax.ShapeDtypeStruct((S, B_pad, NH), jnp.float32),
        grid_spec=grid_spec,
        compiler_params=pltpu.CompilerParams(
            # batch blocks are independent -> megacore/v7x can split the grid
            dimension_semantics=("parallel",),
            # NOTE: no vmem_limit_bytes override - the resident footprint
            # (~1 MiB at these shapes) is far below the scoped default on all
            # generations; requesting 64 MiB (all of a v7x core) was removed.
        ),
    )(GXr, GXu, GXc, W_r, W_u, W_c)

    return out[:, :B, :]                                             # (S, B, N*H)


def tgcn_reference(x, L_sym, Wg, bg, Wc, bc, H):
    """Direct jnp port of the PyTorch forward (for verification)."""
    B, S, N = x.shape
    state = jnp.zeros((B, N * H), jnp.float32)

    def cell(xt, st, W, b):
        z = jnp.concatenate([xt[:, :, None], st.reshape(B, N, H)], axis=2)  # (B,N,H+1)
        y = jnp.einsum('nm,bmh->bnh', L_sym, z, precision='highest')
        y = jnp.einsum('bnh,oh->bno', y, W, precision='highest') + b
        return y.reshape(B, -1)

    outs = []
    for i in range(S):
        xt = x[:, i]
        gates = 1.0 / (1.0 + jnp.exp(-cell(xt, state, Wg, bg)))
        NH = gates.shape[1] // 2
        r, u = gates[:, :NH], gates[:, NH:]
        cand = jnp.tanh(cell(xt, r * state, Wc, bc))
        state = u * state + (1.0 - u) * cand
        outs.append(state)
    return jnp.stack(outs, axis=0)                                   # (S, B, N*H)


if __name__ == "__main__":
    B, S, N, H = 32, 6, 8, 16     # NH = 128 (lane-aligned); batch gives 2 grid blocks

    key = jax.random.PRNGKey(0)
    k_adj, k_x, k_wg, k_wc = jax.random.split(key, 4)

    # deterministic synthetic adjacency (no self loops), normalized as in __init__
    adj = (jax.random.uniform(k_adj, (N, N)) > 0.6).astype(jnp.float32)
    adj = adj * (1.0 - jnp.eye(N, dtype=jnp.float32))
    A = adj + jnp.eye(N, dtype=jnp.float32)
    row_sum = A.sum(1)
    d_inv_sqrt = jnp.power(row_sum, -0.5)
    d_inv_sqrt = jnp.where(jnp.isinf(d_inv_sqrt), 0.0, d_inv_sqrt)
    D = jnp.diag(d_inv_sqrt)
    L_sym = (A @ D).T @ D

    # parameters: nn.Linear weights are (out, in); gate/cand biases init to ones
    Wg = 0.2 * jax.random.normal(k_wg, (2 * H, H + 1), dtype=jnp.float32)
    Wc = 0.2 * jax.random.normal(k_wc, (H, H + 1), dtype=jnp.float32)
    bg = jnp.ones((2 * H,), jnp.float32)
    bc = jnp.ones((H,), jnp.float32)

    x = jax.random.normal(k_x, (B, S, N), dtype=jnp.float32)

    out = tgcn_pallas(x, L_sym, Wg, bg, Wc, bc, H)
    out = jax.block_until_ready(out)

    ref = tgcn_reference(x, L_sym, Wg, bg, Wc, bc, H)
    assert out.shape == (S, B, N * H)
    err = float(jnp.max(jnp.abs(out - ref)))
    # bf16 weights / streams with f32 accumulate over an S-step recurrence:
    # 2e-2 tolerance comfortably covers the rounding (measured err ~1e-3..1e-2).
    if not bool(jnp.allclose(out, ref, atol=2e-2, rtol=2e-2)):
        raise SystemExit(f"mismatch vs reference, max abs err = {err}")
    print("KERNEL_OK")
</pallas_src>

<mosaic_0001>
module attributes {stable_mosaic.version = 11 : i64} {
  func.func @tgcn_kernel(%arg0: i32, %arg1: memref<6x16x128xbf16, #tpu.memory_space<vmem>>, %arg2: memref<6x16x128xbf16, #tpu.memory_space<vmem>>, %arg3: memref<6x16x128xbf16, #tpu.memory_space<vmem>>, %arg4: memref<128x128xbf16, #tpu.memory_space<vmem>>, %arg5: memref<128x128xbf16, #tpu.memory_space<vmem>>, %arg6: memref<128x128xbf16, #tpu.memory_space<vmem>>, %arg7: memref<6x16x128xf32, #tpu.memory_space<vmem>>) attributes {dimension_semantics = [#tpu.dimension_semantics<parallel>], iteration_bounds = array<i64: 2>, scalar_prefetch = 0 : i64, scratch_operands = 0 : i64, tpu.core_type = #tpu.core_type<tc>, window_params = [{transform_indices = @transform_0, window_bounds = array<i64: 6, 16, 128>}, {transform_indices = @transform_1, window_bounds = array<i64: 6, 16, 128>}, {transform_indices = @transform_2, window_bounds = array<i64: 6, 16, 128>}, {pipeline_mode = #tpu.pipeline_mode<synchronous>, transform_indices = @transform_3, window_bounds = array<i64: 128, 128>}, {pipeline_mode = #tpu.pipeline_mode<synchronous>, transform_indices = @transform_4, window_bounds = array<i64: 128, 128>}, {pipeline_mode = #tpu.pipeline_mode<synchronous>, transform_indices = @transform_5, window_bounds = array<i64: 128, 128>}, {transform_indices = @transform_6, window_bounds = array<i64: 6, 16, 128>}]} {
    %cst = arith.constant 0.000000e+00 : f32
    %0 = vector.broadcast %cst : f32 to vector<16x128xf32>
    %c0_i32 = arith.constant 0 : i32
    %1 = arith.truncf %0 : vector<16x128xf32> to vector<16x128xbf16>
    %c0 = arith.constant 0 : index
    %c0_0 = arith.constant 0 : index
    %2 = vector.load %arg4[%c0, %c0_0] : memref<128x128xbf16, #tpu.memory_space<vmem>>, vector<128x128xbf16>
    %cst_1 = arith.constant dense<0.000000e+00> : vector<16x128xf32>
    %3 = tpu.matmul %1, %2, %cst_1 {dimension_numbers = #tpu.dot_dimension_numbers<[1], [0], [0], [1], [0, 0, 1, 1], [], []>} : vector<16x128xbf16>, vector<128x128xbf16>, vector<16x128xf32> -> vector<16x128xf32>
    %c0_2 = arith.constant 0 : index
    %c0_3 = arith.constant 0 : index
    %4 = vector.load %arg5[%c0_2, %c0_3] : memref<128x128xbf16, #tpu.memory_space<vmem>>, vector<128x128xbf16>
    %cst_4 = arith.constant dense<0.000000e+00> : vector<16x128xf32>
    %5 = tpu.matmul %1, %4, %cst_4 {dimension_numbers = #tpu.dot_dimension_numbers<[1], [0], [0], [1], [0, 0, 1, 1], [], []>} : vector<16x128xbf16>, vector<128x128xbf16>, vector<16x128xf32> -> vector<16x128xf32>
    %6 = arith.index_cast %c0_i32 : i32 to index
    %c0_5 = arith.constant 0 : index
    %c0_6 = arith.constant 0 : index
    %7 = vector.load %arg1[%6, %c0_5, %c0_6] : memref<6x16x128xbf16, #tpu.memory_space<vmem>>, vector<1x16x128xbf16>
    %8 = vector.shape_cast %7 : vector<1x16x128xbf16> to vector<16x128xbf16>
    %9 = arith.extf %8 : vector<16x128xbf16> to vector<16x128xf32>
    %10 = arith.addf %9, %3 : vector<16x128xf32>
    %cst_7 = arith.constant 0.000000e+00 : f32
    %11 = vector.broadcast %cst_7 : f32 to vector<16x128xf32>
    %12 = arith.subf %11, %10 : vector<16x128xf32>
    %13 = math.exp %12 : vector<16x128xf32>
    %cst_8 = arith.constant 1.000000e+00 : f32
    %14 = vector.broadcast %cst_8 : f32 to vector<16x128xf32>
    %15 = arith.addf %14, %13 : vector<16x128xf32>
    %cst_9 = arith.constant 1.000000e+00 : f32
    %16 = vector.broadcast %cst_9 : f32 to vector<16x128xf32>
    %17 = arith.divf %16, %15 : vector<16x128xf32>
    %18 = arith.mulf %17, %0 : vector<16x128xf32>
    %19 = arith.truncf %18 : vector<16x128xf32> to vector<16x128xbf16>
    %c0_10 = arith.constant 0 : index
    %c0_11 = arith.constant 0 : index
    %20 = vector.load %arg6[%c0_10, %c0_11] : memref<128x128xbf16, #tpu.memory_space<vmem>>, vector<128x128xbf16>
    %cst_12 = arith.constant dense<0.000000e+00> : vector<16x128xf32>
    %21 = tpu.matmul %19, %20, %cst_12 {dimension_numbers = #tpu.dot_dimension_numbers<[1], [0], [0], [1], [0, 0, 1, 1], [], []>} : vector<16x128xbf16>, vector<128x128xbf16>, vector<16x128xf32> -> vector<16x128xf32>
    %22 = arith.index_cast %c0_i32 : i32 to index
    %c0_13 = arith.constant 0 : index
    %c0_14 = arith.constant 0 : index
    %23 = vector.load %arg2[%22, %c0_13, %c0_14] : memref<6x16x128xbf16, #tpu.memory_space<vmem>>, vector<1x16x128xbf16>
    %24 = vector.shape_cast %23 : vector<1x16x128xbf16> to vector<16x128xbf16>
    %25 = arith.extf %24 : vector<16x128xbf16> to vector<16x128xf32>
    %26 = arith.addf %25, %5 : vector<16x128xf32>
    %cst_15 = arith.constant 0.000000e+00 : f32
    %27 = vector.broadcast %cst_15 : f32 to vector<16x128xf32>
    %28 = arith.subf %27, %26 : vector<16x128xf32>
    %29 = math.exp %28 : vector<16x128xf32>
    %cst_16 = arith.constant 1.000000e+00 : f32
    %30 = vector.broadcast %cst_16 : f32 to vector<16x128xf32>
    %31 = arith.addf %30, %29 : vector<16x128xf32>
    %cst_17 = arith.constant 1.000000e+00 : f32
    %32 = vector.broadcast %cst_17 : f32 to vector<16x128xf32>
    %33 = arith.divf %32, %31 : vector<16x128xf32>
    %34 = arith.index_cast %c0_i32 : i32 to index
    %c0_18 = arith.constant 0 : index
    %c0_19 = arith.constant 0 : index
    %35 = vector.load %arg3[%34, %c0_18, %c0_19] : memref<6x16x128xbf16, #tpu.memory_space<vmem>>, vector<1x16x128xbf16>
    %36 = vector.shape_cast %35 : vector<1x16x128xbf16> to vector<16x128xbf16>
    %37 = arith.extf %36 : vector<16x128xbf16> to vector<16x128xf32>
    %38 = arith.addf %37, %21 : vector<16x128xf32>
    %39 = math.tanh %38 : vector<16x128xf32>
    %40 = arith.mulf %33, %0 : vector<16x128xf32>
    %cst_20 = arith.constant 1.000000e+00 : f32
    %41 = vector.broadcast %cst_20 : f32 to vector<16x128xf32>
    %42 = arith.subf %41, %33 : vector<16x128xf32>
    %43 = arith.mulf %42, %39 : vector<16x128xf32>
    %44 = arith.addf %40, %43 : vector<16x128xf32>
    %45 = arith.index_cast %c0_i32 : i32 to index
    %c0_21 = arith.constant 0 : index
    %c0_22 = arith.constant 0 : index
    %46 = vector.load %arg7[%45, %c0_21, %c0_22] : memref<6x16x128xf32, #tpu.memory_space<vmem>>, vector<1x16x128xf32>
    %47 = vector.shape_cast %46 : vector<1x16x128xf32> to vector<16x128xf32>
    %48 = vector.shape_cast %44 : vector<16x128xf32> to vector<1x16x128xf32>
    tpu.vector_store %arg7[%45, %c0_21, %c0_22], %48 {strides = array<i32>} : memref<6x16x128xf32, #tpu.memory_space<vmem>>, vector<1x16x128xf32>,
    %c1_i32 = arith.constant 1 : i32
    %49 = arith.truncf %44 : vector<16x128xf32> to vector<16x128xbf16>
    %c0_23 = arith.constant 0 : index
    %c0_24 = arith.constant 0 : index
    %50 = vector.load %arg4[%c0_23, %c0_24] : memref<128x128xbf16, #tpu.memory_space<vmem>>, vector<128x128xbf16>
    %cst_25 = arith.constant dense<0.000000e+00> : vector<16x128xf32>
    %51 = tpu.matmul %49, %50, %cst_25 {dimension_numbers = #tpu.dot_dimension_numbers<[1], [0], [0], [1], [0, 0, 1, 1], [], []>} : vector<16x128xbf16>, vector<128x128xbf16>, vector<16x128xf32> -> vector<16x128xf32>
    %c0_26 = arith.constant 0 : index
    %c0_27 = arith.constant 0 : index
    %52 = vector.load %arg5[%c0_26, %c0_27] : memref<128x128xbf16, #tpu.memory_space<vmem>>, vector<128x128xbf16>
    %cst_28 = arith.constant dense<0.000000e+00> : vector<16x128xf32>
    %53 = tpu.matmul %49, %52, %cst_28 {dimension_numbers = #tpu.dot_dimension_numbers<[1], [0], [0], [1], [0, 0, 1, 1], [], []>} : vector<16x128xbf16>, vector<128x128xbf16>, vector<16x128xf32> -> vector<16x128xf32>
    %54 = arith.index_cast %c1_i32 : i32 to index
    %c0_29 = arith.constant 0 : index
    %c0_30 = arith.constant 0 : index
    %55 = vector.load %arg1[%54, %c0_29, %c0_30] : memref<6x16x128xbf16, #tpu.memory_space<vmem>>, vector<1x16x128xbf16>
    %56 = vector.shape_cast %55 : vector<1x16x128xbf16> to vector<16x128xbf16>
    %57 = arith.extf %56 : vector<16x128xbf16> to vector<16x128xf32>
    %58 = arith.addf %57, %51 : vector<16x128xf32>
    %cst_31 = arith.constant 0.000000e+00 : f32
    %59 = vector.broadcast %cst_31 : f32 to vector<16x128xf32>
    %60 = arith.subf %59, %58 : vector<16x128xf32>
    %61 = math.exp %60 : vector<16x128xf32>
    %cst_32 = arith.constant 1.000000e+00 : f32
    %62 = vector.broadcast %cst_32 : f32 to vector<16x128xf32>
    %63 = arith.addf %62, %61 : vector<16x128xf32>
    %cst_33 = arith.constant 1.000000e+00 : f32
    %64 = vector.broadcast %cst_33 : f32 to vector<16x128xf32>
    %65 = arith.divf %64, %63 : vector<16x128xf32>
    %66 = arith.mulf %65, %44 : vector<16x128xf32>
    %67 = arith.truncf %66 : vector<16x128xf32> to vector<16x128xbf16>
    %c0_34 = arith.constant 0 : index
    %c0_35 = arith.constant 0 : index
    %68 = vector.load %arg6[%c0_34, %c0_35] : memref<128x128xbf16, #tpu.memory_space<vmem>>, vector<128x128xbf16>
    %cst_36 = arith.constant dense<0.000000e+00> : vector<16x128xf32>
    %69 = tpu.matmul %67, %68, %cst_36 {dimension_numbers = #tpu.dot_dimension_numbers<[1], [0], [0], [1], [0, 0, 1, 1], [], []>} : vector<16x128xbf16>, vector<128x128xbf16>, vector<16x128xf32> -> vector<16x128xf32>
    %70 = arith.index_cast %c1_i32 : i32 to index
    %c0_37 = arith.constant 0 : index
    %c0_38 = arith.constant 0 : index
    %71 = vector.load %arg2[%70, %c0_37, %c0_38] : memref<6x16x128xbf16, #tpu.memory_space<vmem>>, vector<1x16x128xbf16>
    %72 = vector.shape_cast %71 : vector<1x16x128xbf16> to vector<16x128xbf16>
    %73 = arith.extf %72 : vector<16x128xbf16> to vector<16x128xf32>
    %74 = arith.addf %73, %53 : vector<16x128xf32>
    %cst_39 = arith.constant 0.000000e+00 : f32
    %75 = vector.broadcast %cst_39 : f32 to vector<16x128xf32>
    %76 = arith.subf %75, %74 : vector<16x128xf32>
    %77 = math.exp %76 : vector<16x128xf32>
    %cst_40 = arith.constant 1.000000e+00 : f32
    %78 = vector.broadcast %cst_40 : f32 to vector<16x128xf32>
    %79 = arith.addf %78, %77 : vector<16x128xf32>
    %cst_41 = arith.constant 1.000000e+00 : f32
    %80 = vector.broadcast %cst_41 : f32 to vector<16x128xf32>
    %81 = arith.divf %80, %79 : vector<16x128xf32>
    %82 = arith.index_cast %c1_i32 : i32 to index
    %c0_42 = arith.constant 0 : index
    %c0_43 = arith.constant 0 : index
    %83 = vector.load %arg3[%82, %c0_42, %c0_43] : memref<6x16x128xbf16, #tpu.memory_space<vmem>>, vector<1x16x128xbf16>
    %84 = vector.shape_cast %83 : vector<1x16x128xbf16> to vector<16x128xbf16>
    %85 = arith.extf %84 : vector<16x128xbf16> to vector<16x128xf32>
    %86 = arith.addf %85, %69 : vector<16x128xf32>
    %87 = math.tanh %86 : vector<16x128xf32>
    %88 = arith.mulf %81, %44 : vector<16x128xf32>
    %cst_44 = arith.constant 1.000000e+00 : f32
    %89 = vector.broadcast %cst_44 : f32 to vector<16x128xf32>
    %90 = arith.subf %89, %81 : vector<16x128xf32>
    %91 = arith.mulf %90, %87 : vector<16x128xf32>
    %92 = arith.addf %88, %91 : vector<16x128xf32>
    %93 = arith.index_cast %c1_i32 : i32 to index
    %c0_45 = arith.constant 0 : index
    %c0_46 = arith.constant 0 : index
    %94 = vector.load %arg7[%93, %c0_45, %c0_46] : memref<6x16x128xf32, #tpu.memory_space<vmem>>, vector<1x16x128xf32>
    %95 = vector.shape_cast %94 : vector<1x16x128xf32> to vector<16x128xf32>
    %96 = vector.shape_cast %92 : vector<16x128xf32> to vector<1x16x128xf32>
    tpu.vector_store %arg7[%93, %c0_45, %c0_46], %96 {strides = array<i32>} : memref<6x16x128xf32, #tpu.memory_space<vmem>>, vector<1x16x128xf32>,
    %c2_i32 = arith.constant 2 : i32
    %97 = arith.truncf %92 : vector<16x128xf32> to vector<16x128xbf16>
    %c0_47 = arith.constant 0 : index
    %c0_48 = arith.constant 0 : index
    %98 = vector.load %arg4[%c0_47, %c0_48] : memref<128x128xbf16, #tpu.memory_space<vmem>>, vector<128x128xbf16>
    %cst_49 = arith.constant dense<0.000000e+00> : vector<16x128xf32>
    %99 = tpu.matmul %97, %98, %cst_49 {dimension_numbers = #tpu.dot_dimension_numbers<[1], [0], [0], [1], [0, 0, 1, 1], [], []>} : vector<16x128xbf16>, vector<128x128xbf16>, vector<16x128xf32> -> vector<16x128xf32>
    %c0_50 = arith.constant 0 : index
    %c0_51 = arith.constant 0 : index
    %100 = vector.load %arg5[%c0_50, %c0_51] : memref<128x128xbf16, #tpu.memory_space<vmem>>, vector<128x128xbf16>
    %cst_52 = arith.constant dense<0.000000e+00> : vector<16x128xf32>
    %101 = tpu.matmul %97, %100, %cst_52 {dimension_numbers = #tpu.dot_dimension_numbers<[1], [0], [0], [1], [0, 0, 1, 1], [], []>} : vector<16x128xbf16>, vector<128x128xbf16>, vector<16x128xf32> -> vector<16x128xf32>
    %102 = arith.index_cast %c2_i32 : i32 to index
    %c0_53 = arith.constant 0 : index
    %c0_54 = arith.constant 0 : index
    %103 = vector.load %arg1[%102, %c0_53, %c0_54] : memref<6x16x128xbf16, #tpu.memory_space<vmem>>, vector<1x16x128xbf16>
    %104 = vector.shape_cast %103 : vector<1x16x128xbf16> to vector<16x128xbf16>
    %105 = arith.extf %104 : vector<16x128xbf16> to vector<16x128xf32>
    %106 = arith.addf %105, %99 : vector<16x128xf32>
    %cst_55 = arith.constant 0.000000e+00 : f32
    %107 = vector.broadcast %cst_55 : f32 to vector<16x128xf32>
    %108 = arith.subf %107, %106 : vector<16x128xf32>
    %109 = math.exp %108 : vector<16x128xf32>
    %cst_56 = arith.constant 1.000000e+00 : f32
    %110 = vector.broadcast %cst_56 : f32 to vector<16x128xf32>
    %111 = arith.addf %110, %109 : vector<16x128xf32>
    %cst_57 = arith.constant 1.000000e+00 : f32
    %112 = vector.broadcast %cst_57 : f32 to vector<16x128xf32>
    %113 = arith.divf %112, %111 : vector<16x128xf32>
    %114 = arith.mulf %113, %92 : vector<16x128xf32>
    %115 = arith.truncf %114 : vector<16x128xf32> to vector<16x128xbf16>
    %c0_58 = arith.constant 0 : index
    %c0_59 = arith.constant 0 : index
    %116 = vector.load %arg6[%c0_58, %c0_59] : memref<128x128xbf16, #tpu.memory_space<vmem>>, vector<128x128xbf16>
    %cst_60 = arith.constant dense<0.000000e+00> : vector<16x128xf32>
    %117 = tpu.matmul %115, %116, %cst_60 {dimension_numbers = #tpu.dot_dimension_numbers<[1], [0], [0], [1], [0, 0, 1, 1], [], []>} : vector<16x128xbf16>, vector<128x128xbf16>, vector<16x128xf32> -> vector<16x128xf32>
    %118 = arith.index_cast %c2_i32 : i32 to index
    %c0_61 = arith.constant 0 : index
    %c0_62 = arith.constant 0 : index
    %119 = vector.load %arg2[%118, %c0_61, %c0_62] : memref<6x16x128xbf16, #tpu.memory_space<vmem>>, vector<1x16x128xbf16>
    %120 = vector.shape_cast %119 : vector<1x16x128xbf16> to vector<16x128xbf16>
    %121 = arith.extf %120 : vector<16x128xbf16> to vector<16x128xf32>
    %122 = arith.addf %121, %101 : vector<16x128xf32>
    %cst_63 = arith.constant 0.000000e+00 : f32
    %123 = vector.broadcast %cst_63 : f32 to vector<16x128xf32>
    %124 = arith.subf %123, %122 : vector<16x128xf32>
    %125 = math.exp %124 : vector<16x128xf32>
    %cst_64 = arith.constant 1.000000e+00 : f32
    %126 = vector.broadcast %cst_64 : f32 to vector<16x128xf32>
    %127 = arith.addf %126, %125 : vector<16x128xf32>
    %cst_65 = arith.constant 1.000000e+00 : f32
    %128 = vector.broadcast %cst_65 : f32 to vector<16x128xf32>
    %129 = arith.divf %128, %127 : vector<16x128xf32>
    %130 = arith.index_cast %c2_i32 : i32 to index
    %c0_66 = arith.constant 0 : index
    %c0_67 = arith.constant 0 : index
    %131 = vector.load %arg3[%130, %c0_66, %c0_67] : memref<6x16x128xbf16, #tpu.memory_space<vmem>>, vector<1x16x128xbf16>
    %132 = vector.shape_cast %131 : vector<1x16x128xbf16> to vector<16x128xbf16>
    %133 = arith.extf %132 : vector<16x128xbf16> to vector<16x128xf32>
    %134 = arith.addf %133, %117 : vector<16x128xf32>
    %135 = math.tanh %134 : vector<16x128xf32>
    %136 = arith.mulf %129, %92 : vector<16x128xf32>
    %cst_68 = arith.constant 1.000000e+00 : f32
    %137 = vector.broadcast %cst_68 : f32 to vector<16x128xf32>
    %138 = arith.subf %137, %129 : vector<16x128xf32>
    %139 = arith.mulf %138, %135 : vector<16x128xf32>
    %140 = arith.addf %136, %139 : vector<16x128xf32>
    %141 = arith.index_cast %c2_i32 : i32 to index
    %c0_69 = arith.constant 0 : index
    %c0_70 = arith.constant 0 : index
    %142 = vector.load %arg7[%141, %c0_69, %c0_70] : memref<6x16x128xf32, #tpu.memory_space<vmem>>, vector<1x16x128xf32>
    %143 = vector.shape_cast %142 : vector<1x16x128xf32> to vector<16x128xf32>
    %144 = vector.shape_cast %140 : vector<16x128xf32> to vector<1x16x128xf32>
    tpu.vector_store %arg7[%141, %c0_69, %c0_70], %144 {strides = array<i32>} : memref<6x16x128xf32, #tpu.memory_space<vmem>>, vector<1x16x128xf32>,
    %c3_i32 = arith.constant 3 : i32
    %145 = arith.truncf %140 : vector<16x128xf32> to vector<16x128xbf16>
    %c0_71 = arith.constant 0 : index
    %c0_72 = arith.constant 0 : index
    %146 = vector.load %arg4[%c0_71, %c0_72] : memref<128x128xbf16, #tpu.memory_space<vmem>>, vector<128x128xbf16>
    %cst_73 = arith.constant dense<0.000000e+00> : vector<16x128xf32>
    %147 = tpu.matmul %145, %146, %cst_73 {dimension_numbers = #tpu.dot_dimension_numbers<[1], [0], [0], [1], [0, 0, 1, 1], [], []>} : vector<16x128xbf16>, vector<128x128xbf16>, vector<16x128xf32> -> vector<16x128xf32>
    %c0_74 = arith.constant 0 : index
    %c0_75 = arith.constant 0 : index
    %148 = vector.load %arg5[%c0_74, %c0_75] : memref<128x128xbf16, #tpu.memory_space<vmem>>, vector<128x128xbf16>
    %cst_76 = arith.constant dense<0.000000e+00> : vector<16x128xf32>
    %149 = tpu.matmul %145, %148, %cst_76 {dimension_numbers = #tpu.dot_dimension_numbers<[1], [0], [0], [1], [0, 0, 1, 1], [], []>} : vector<16x128xbf16>, vector<128x128xbf16>, vector<16x128xf32> -> vector<16x128xf32>
    %150 = arith.index_cast %c3_i32 : i32 to index
    %c0_77 = arith.constant 0 : index
    %c0_78 = arith.constant 0 : index
    %151 = vector.load %arg1[%150, %c0_77, %c0_78] : memref<6x16x128xbf16, #tpu.memory_space<vmem>>, vector<1x16x128xbf16>
    %152 = vector.shape_cast %151 : vector<1x16x128xbf16> to vector<16x128xbf16>
    %153 = arith.extf %152 : vector<16x128xbf16> to vector<16x128xf32>
    %154 = arith.addf %153, %147 : vector<16x128xf32>
    %cst_79 = arith.constant 0.000000e+00 : f32
    %155 = vector.broadcast %cst_79 : f32 to vector<16x128xf32>
    %156 = arith.subf %155, %154 : vector<16x128xf32>
    %157 = math.exp %156 : vector<16x128xf32>
    %cst_80 = arith.constant 1.000000e+00 : f32
    %158 = vector.broadcast %cst_80 : f32 to vector<16x128xf32>
    %159 = arith.addf %158, %157 : vector<16x128xf32>
    %cst_81 = arith.constant 1.000000e+00 : f32
    %160 = vector.broadcast %cst_81 : f32 to vector<16x128xf32>
    %161 = arith.divf %160, %159 : vector<16x128xf32>
    %162 = arith.mulf %161, %140 : vector<16x128xf32>
    %163 = arith.truncf %162 : vector<16x128xf32> to vector<16x128xbf16>
    %c0_82 = arith.constant 0 : index
    %c0_83 = arith.constant 0 : index
    %164 = vector.load %arg6[%c0_82, %c0_83] : memref<128x128xbf16, #tpu.memory_space<vmem>>, vector<128x128xbf16>
    %cst_84 = arith.constant dense<0.000000e+00> : vector<16x128xf32>
    %165 = tpu.matmul %163, %164, %cst_84 {dimension_numbers = #tpu.dot_dimension_numbers<[1], [0], [0], [1], [0, 0, 1, 1], [], []>} : vector<16x128xbf16>, vector<128x128xbf16>, vector<16x128xf32> -> vector<16x128xf32>
    %166 = arith.index_cast %c3_i32 : i32 to index
    %c0_85 = arith.constant 0 : index
    %c0_86 = arith.constant 0 : index
    %167 = vector.load %arg2[%166, %c0_85, %c0_86] : memref<6x16x128xbf16, #tpu.memory_space<vmem>>, vector<1x16x128xbf16>
    %168 = vector.shape_cast %167 : vector<1x16x128xbf16> to vector<16x128xbf16>
    %169 = arith.extf %168 : vector<16x128xbf16> to vector<16x128xf32>
    %170 = arith.addf %169, %149 : vector<16x128xf32>
    %cst_87 = arith.constant 0.000000e+00 : f32
    %171 = vector.broadcast %cst_87 : f32 to vector<16x128xf32>
    %172 = arith.subf %171, %170 : vector<16x128xf32>
    %173 = math.exp %172 : vector<16x128xf32>
    %cst_88 = arith.constant 1.000000e+00 : f32
    %174 = vector.broadcast %cst_88 : f32 to vector<16x128xf32>
    %175 = arith.addf %174, %173 : vector<16x128xf32>
    %cst_89 = arith.constant 1.000000e+00 : f32
    %176 = vector.broadcast %cst_89 : f32 to vector<16x128xf32>
    %177 = arith.divf %176, %175 : vector<16x128xf32>
    %178 = arith.index_cast %c3_i32 : i32 to index
    %c0_90 = arith.constant 0 : index
    %c0_91 = arith.constant 0 : index
    %179 = vector.load %arg3[%178, %c0_90, %c0_91] : memref<6x16x128xbf16, #tpu.memory_space<vmem>>, vector<1x16x128xbf16>
    %180 = vector.shape_cast %179 : vector<1x16x128xbf16> to vector<16x128xbf16>
    %181 = arith.extf %180 : vector<16x128xbf16> to vector<16x128xf32>
    %182 = arith.addf %181, %165 : vector<16x128xf32>
    %183 = math.tanh %182 : vector<16x128xf32>
    %184 = arith.mulf %177, %140 : vector<16x128xf32>
    %cst_92 = arith.constant 1.000000e+00 : f32
    %185 = vector.broadcast %cst_92 : f32 to vector<16x128xf32>
    %186 = arith.subf %185, %177 : vector<16x128xf32>
    %187 = arith.mulf %186, %183 : vector<16x128xf32>
    %188 = arith.addf %184, %187 : vector<16x128xf32>
    %189 = arith.index_cast %c3_i32 : i32 to index
    %c0_93 = arith.constant 0 : index
    %c0_94 = arith.constant 0 : index
    %190 = vector.load %arg7[%189, %c0_93, %c0_94] : memref<6x16x128xf32, #tpu.memory_space<vmem>>, vector<1x16x128xf32>
    %191 = vector.shape_cast %190 : vector<1x16x128xf32> to vector<16x128xf32>
    %192 = vector.shape_cast %188 : vector<16x128xf32> to vector<1x16x128xf32>
    tpu.vector_store %arg7[%189, %c0_93, %c0_94], %192 {strides = array<i32>} : memref<6x16x128xf32, #tpu.memory_space<vmem>>, vector<1x16x128xf32>,
    %c4_i32 = arith.constant 4 : i32
    %193 = arith.truncf %188 : vector<16x128xf32> to vector<16x128xbf16>
    %c0_95 = arith.constant 0 : index
    %c0_96 = arith.constant 0 : index
    %194 = vector.load %arg4[%c0_95, %c0_96] : memref<128x128xbf16, #tpu.memory_space<vmem>>, vector<128x128xbf16>
    %cst_97 = arith.constant dense<0.000000e+00> : vector<16x128xf32>
    %195 = tpu.matmul %193, %194, %cst_97 {dimension_numbers = #tpu.dot_dimension_numbers<[1], [0], [0], [1], [0, 0, 1, 1], [], []>} : vector<16x128xbf16>, vector<128x128xbf16>, vector<16x128xf32> -> vector<16x128xf32>
    %c0_98 = arith.constant 0 : index
    %c0_99 = arith.constant 0 : index
    %196 = vector.load %arg5[%c0_98, %c0_99] : memref<128x128xbf16, #tpu.memory_space<vmem>>, vector<128x128xbf16>
    %cst_100 = arith.constant dense<0.000000e+00> : vector<16x128xf32>
    %197 = tpu.matmul %193, %196, %cst_100 {dimension_numbers = #tpu.dot_dimension_numbers<[1], [0], [0], [1], [0, 0, 1, 1], [], []>} : vector<16x128xbf16>, vector<128x128xbf16>, vector<16x128xf32> -> vector<16x128xf32>
    %198 = arith.index_cast %c4_i32 : i32 to index
    %c0_101 = arith.constant 0 : index
    %c0_102 = arith.constant 0 : index
    %199 = vector.load %arg1[%198, %c0_101, %c0_102] : memref<6x16x128xbf16, #tpu.memory_space<vmem>>, vector<1x16x128xbf16>
    %200 = vector.shape_cast %199 : vector<1x16x128xbf16> to vector<16x128xbf16>
    %201 = arith.extf %200 : vector<16x128xbf16> to vector<16x128xf32>
    %202 = arith.addf %201, %195 : vector<16x128xf32>
    %cst_103 = arith.constant 0.000000e+00 : f32
    %203 = vector.broadcast %cst_103 : f32 to vector<16x128xf32>
    %204 = arith.subf %203, %202 : vector<16x128xf32>
    %205 = math.exp %204 : vector<16x128xf32>
    %cst_104 = arith.constant 1.000000e+00 : f32
    %206 = vector.broadcast %cst_104 : f32 to vector<16x128xf32>
    %207 = arith.addf %206, %205 : vector<16x128xf32>
    %cst_105 = arith.constant 1.000000e+00 : f32
    %208 = vector.broadcast %cst_105 : f32 to vector<16x128xf32>
    %209 = arith.divf %208, %207 : vector<16x128xf32>
    %210 = arith.mulf %209, %188 : vector<16x128xf32>
    %211 = arith.truncf %210 : vector<16x128xf32> to vector<16x128xbf16>
    %c0_106 = arith.constant 0 : index
    %c0_107 = arith.constant 0 : index
    %212 = vector.load %arg6[%c0_106, %c0_107] : memref<128x128xbf16, #tpu.memory_space<vmem>>, vector<128x128xbf16>
    %cst_108 = arith.constant dense<0.000000e+00> : vector<16x128xf32>
    %213 = tpu.matmul %211, %212, %cst_108 {dimension_numbers = #tpu.dot_dimension_numbers<[1], [0], [0], [1], [0, 0, 1, 1], [], []>} : vector<16x128xbf16>, vector<128x128xbf16>, vector<16x128xf32> -> vector<16x128xf32>
    %214 = arith.index_cast %c4_i32 : i32 to index
    %c0_109 = arith.constant 0 : index
    %c0_110 = arith.constant 0 : index
    %215 = vector.load %arg2[%214, %c0_109, %c0_110] : memref<6x16x128xbf16, #tpu.memory_space<vmem>>, vector<1x16x128xbf16>
    %216 = vector.shape_cast %215 : vector<1x16x128xbf16> to vector<16x128xbf16>
    %217 = arith.extf %216 : vector<16x128xbf16> to vector<16x128xf32>
    %218 = arith.addf %217, %197 : vector<16x128xf32>
    %cst_111 = arith.constant 0.000000e+00 : f32
    %219 = vector.broadcast %cst_111 : f32 to vector<16x128xf32>
    %220 = arith.subf %219, %218 : vector<16x128xf32>
    %221 = math.exp %220 : vector<16x128xf32>
    %cst_112 = arith.constant 1.000000e+00 : f32
    %222 = vector.broadcast %cst_112 : f32 to vector<16x128xf32>
    %223 = arith.addf %222, %221 : vector<16x128xf32>
    %cst_113 = arith.constant 1.000000e+00 : f32
    %224 = vector.broadcast %cst_113 : f32 to vector<16x128xf32>
    %225 = arith.divf %224, %223 : vector<16x128xf32>
    %226 = arith.index_cast %c4_i32 : i32 to index
    %c0_114 = arith.constant 0 : index
    %c0_115 = arith.constant 0 : index
    %227 = vector.load %arg3[%226, %c0_114, %c0_115] : memref<6x16x128xbf16, #tpu.memory_space<vmem>>, vector<1x16x128xbf16>
    %228 = vector.shape_cast %227 : vector<1x16x128xbf16> to vector<16x128xbf16>
    %229 = arith.extf %228 : vector<16x128xbf16> to vector<16x128xf32>
    %230 = arith.addf %229, %213 : vector<16x128xf32>
    %231 = math.tanh %230 : vector<16x128xf32>
    %232 = arith.mulf %225, %188 : vector<16x128xf32>
    %cst_116 = arith.constant 1.000000e+00 : f32
    %233 = vector.broadcast %cst_116 : f32 to vector<16x128xf32>
    %234 = arith.subf %233, %225 : vector<16x128xf32>
    %235 = arith.mulf %234, %231 : vector<16x128xf32>
    %236 = arith.addf %232, %235 : vector<16x128xf32>
    %237 = arith.index_cast %c4_i32 : i32 to index
    %c0_117 = arith.constant 0 : index
    %c0_118 = arith.constant 0 : index
    %238 = vector.load %arg7[%237, %c0_117, %c0_118] : memref<6x16x128xf32, #tpu.memory_space<vmem>>, vector<1x16x128xf32>
    %239 = vector.shape_cast %238 : vector<1x16x128xf32> to vector<16x128xf32>
    %240 = vector.shape_cast %236 : vector<16x128xf32> to vector<1x16x128xf32>
    tpu.vector_store %arg7[%237, %c0_117, %c0_118], %240 {strides = array<i32>} : memref<6x16x128xf32, #tpu.memory_space<vmem>>, vector<1x16x128xf32>,
    %c5_i32 = arith.constant 5 : i32
    %241 = arith.truncf %236 : vector<16x128xf32> to vector<16x128xbf16>
    %c0_119 = arith.constant 0 : index
    %c0_120 = arith.constant 0 : index
    %242 = vector.load %arg4[%c0_119, %c0_120] : memref<128x128xbf16, #tpu.memory_space<vmem>>, vector<128x128xbf16>
    %cst_121 = arith.constant dense<0.000000e+00> : vector<16x128xf32>
    %243 = tpu.matmul %241, %242, %cst_121 {dimension_numbers = #tpu.dot_dimension_numbers<[1], [0], [0], [1], [0, 0, 1, 1], [], []>} : vector<16x128xbf16>, vector<128x128xbf16>, vector<16x128xf32> -> vector<16x128xf32>
    %c0_122 = arith.constant 0 : index
    %c0_123 = arith.constant 0 : index
    %244 = vector.load %arg5[%c0_122, %c0_123] : memref<128x128xbf16, #tpu.memory_space<vmem>>, vector<128x128xbf16>
    %cst_124 = arith.constant dense<0.000000e+00> : vector<16x128xf32>
    %245 = tpu.matmul %241, %244, %cst_124 {dimension_numbers = #tpu.dot_dimension_numbers<[1], [0], [0], [1], [0, 0, 1, 1], [], []>} : vector<16x128xbf16>, vector<128x128xbf16>, vector<16x128xf32> -> vector<16x128xf32>
    %246 = arith.index_cast %c5_i32 : i32 to index
    %c0_125 = arith.constant 0 : index
    %c0_126 = arith.constant 0 : index
    %247 = vector.load %arg1[%246, %c0_125, %c0_126] : memref<6x16x128xbf16, #tpu.memory_space<vmem>>, vector<1x16x128xbf16>
    %248 = vector.shape_cast %247 : vector<1x16x128xbf16> to vector<16x128xbf16>
    %249 = arith.extf %248 : vector<16x128xbf16> to vector<16x128xf32>
    %250 = arith.addf %249, %243 : vector<16x128xf32>
    %cst_127 = arith.constant 0.000000e+00 : f32
    %251 = vector.broadcast %cst_127 : f32 to vector<16x128xf32>
    %252 = arith.subf %251, %250 : vector<16x128xf32>
    %253 = math.exp %252 : vector<16x128xf32>
    %cst_128 = arith.constant 1.000000e+00 : f32
    %254 = vector.broadcast %cst_128 : f32 to vector<16x128xf32>
    %255 = arith.addf %254, %253 : vector<16x128xf32>
    %cst_129 = arith.constant 1.000000e+00 : f32
    %256 = vector.broadcast %cst_129 : f32 to vector<16x128xf32>
    %257 = arith.divf %256, %255 : vector<16x128xf32>
    %258 = arith.mulf %257, %236 : vector<16x128xf32>
    %259 = arith.truncf %258 : vector<16x128xf32> to vector<16x128xbf16>
    %c0_130 = arith.constant 0 : index
    %c0_131 = arith.constant 0 : index
    %260 = vector.load %arg6[%c0_130, %c0_131] : memref<128x128xbf16, #tpu.memory_space<vmem>>, vector<128x128xbf16>
    %cst_132 = arith.constant dense<0.000000e+00> : vector<16x128xf32>
    %261 = tpu.matmul %259, %260, %cst_132 {dimension_numbers = #tpu.dot_dimension_numbers<[1], [0], [0], [1], [0, 0, 1, 1], [], []>} : vector<16x128xbf16>, vector<128x128xbf16>, vector<16x128xf32> -> vector<16x128xf32>
    %262 = arith.index_cast %c5_i32 : i32 to index
    %c0_133 = arith.constant 0 : index
    %c0_134 = arith.constant 0 : index
    %263 = vector.load %arg2[%262, %c0_133, %c0_134] : memref<6x16x128xbf16, #tpu.memory_space<vmem>>, vector<1x16x128xbf16>
    %264 = vector.shape_cast %263 : vector<1x16x128xbf16> to vector<16x128xbf16>
    %265 = arith.extf %264 : vector<16x128xbf16> to vector<16x128xf32>
    %266 = arith.addf %265, %245 : vector<16x128xf32>
    %cst_135 = arith.constant 0.000000e+00 : f32
    %267 = vector.broadcast %cst_135 : f32 to vector<16x128xf32>
    %268 = arith.subf %267, %266 : vector<16x128xf32>
    %269 = math.exp %268 : vector<16x128xf32>
    %cst_136 = arith.constant 1.000000e+00 : f32
    %270 = vector.broadcast %cst_136 : f32 to vector<16x128xf32>
    %271 = arith.addf %270, %269 : vector<16x128xf32>
    %cst_137 = arith.constant 1.000000e+00 : f32
    %272 = vector.broadcast %cst_137 : f32 to vector<16x128xf32>
    %273 = arith.divf %272, %271 : vector<16x128xf32>
    %274 = arith.index_cast %c5_i32 : i32 to index
    %c0_138 = arith.constant 0 : index
    %c0_139 = arith.constant 0 : index
    %275 = vector.load %arg3[%274, %c0_138, %c0_139] : memref<6x16x128xbf16, #tpu.memory_space<vmem>>, vector<1x16x128xbf16>
    %276 = vector.shape_cast %275 : vector<1x16x128xbf16> to vector<16x128xbf16>
    %277 = arith.extf %276 : vector<16x128xbf16> to vector<16x128xf32>
    %278 = arith.addf %277, %261 : vector<16x128xf32>
    %279 = math.tanh %278 : vector<16x128xf32>
    %280 = arith.mulf %273, %236 : vector<16x128xf32>
    %cst_140 = arith.constant 1.000000e+00 : f32
    %281 = vector.broadcast %cst_140 : f32 to vector<16x128xf32>
    %282 = arith.subf %281, %273 : vector<16x128xf32>
    %283 = arith.mulf %282, %279 : vector<16x128xf32>
    %284 = arith.addf %280, %283 : vector<16x128xf32>
    %285 = arith.index_cast %c5_i32 : i32 to index
    %c0_141 = arith.constant 0 : index
    %c0_142 = arith.constant 0 : index
    %286 = vector.load %arg7[%285, %c0_141, %c0_142] : memref<6x16x128xf32, #tpu.memory_space<vmem>>, vector<1x16x128xf32>
    %287 = vector.shape_cast %286 : vector<1x16x128xf32> to vector<16x128xf32>
    %288 = vector.shape_cast %284 : vector<16x128xf32> to vector<1x16x128xf32>
    tpu.vector_store %arg7[%285, %c0_141, %c0_142], %288 {strides = array<i32>} : memref<6x16x128xf32, #tpu.memory_space<vmem>>, vector<1x16x128xf32>,
    %c6_i32 = arith.constant 6 : i32
    return
  }
  func.func @transform_0(%arg0: i32) -> (i32, i32, i32) {
    %c0_i32 = arith.constant 0 : i32
    %c0_i32_0 = arith.constant 0 : i32
    %c0_i32_1 = arith.constant 0 : i32
    return %c0_i32, %arg0, %c0_i32_0 : i32, i32, i32
  }
  func.func @transform_1(%arg0: i32) -> (i32, i32, i32) {
    %c0_i32 = arith.constant 0 : i32
    %c0_i32_0 = arith.constant 0 : i32
    %c0_i32_1 = arith.constant 0 : i32
    return %c0_i32, %arg0, %c0_i32_0 : i32, i32, i32
  }
  func.func @transform_2(%arg0: i32) -> (i32, i32, i32) {
    %c0_i32 = arith.constant 0 : i32
    %c0_i32_0 = arith.constant 0 : i32
    %c0_i32_1 = arith.constant 0 : i32
    return %c0_i32, %arg0, %c0_i32_0 : i32, i32, i32
  }
  func.func @transform_3(%arg0: i32) -> (i32, i32) {
    %c0_i32 = arith.constant 0 : i32
    %c0_i32_0 = arith.constant 0 : i32
    %c0_i32_1 = arith.constant 0 : i32
    return %c0_i32, %c0_i32_0 : i32, i32
  }
  func.func @transform_4(%arg0: i32) -> (i32, i32) {
    %c0_i32 = arith.constant 0 : i32
    %c0_i32_0 = arith.constant 0 : i32
    %c0_i32_1 = arith.constant 0 : i32
    return %c0_i32, %c0_i32_0 : i32, i32
  }
  func.func @transform_5(%arg0: i32) -> (i32, i32) {
    %c0_i32 = arith.constant 0 : i32
    %c0_i32_0 = arith.constant 0 : i32
    %c0_i32_1 = arith.constant 0 : i32
    return %c0_i32, %c0_i32_0 : i32, i32
  }
  func.func @transform_6(%arg0: i32) -> (i32, i32, i32) {
    %c0_i32 = arith.constant 0 : i32
    %c0_i32_0 = arith.constant 0 : i32
    %c0_i32_1 = arith.constant 0 : i32
    return %c0_i32, %arg0, %c0_i32_0 : i32, i32, i32
  }
}

</mosaic_0001>

<bundles_post_ra>
// kernel: tpu_custom_call.1
= control target key start
LH: loop header
LB: loop body
LE: loop exit
PB: predicated region body
PF: predicated region fallthrough
CT: control target
= control target key end

     0   :  { %s4869_s0 = inlined_call_operand.hbm [shape: bf16[6,32,128], index: 0, kind: input, shape index: {}]   ;;  %s4870_s1 = inlined_call_operand.hbm [shape: bf16[6,32,128], index: 1, kind: input, shape index: {}]   ;;  %s4871_s2 = inlined_call_operand.hbm [shape: bf16[6,32,128], index: 2, kind: input, shape index: {}]   ;;  %s4872_s3 = inlined_call_operand.hbm [shape: bf16[128,128], index: 3, kind: input, shape index: {}]   ;;  %s4873_s4 = inlined_call_operand.hbm [shape: bf16[128,128], index: 4, kind: input, shape index: {}]   ;;  %s4874_s5 = inlined_call_operand.hbm [shape: bf16[128,128], index: 5, kind: input, shape index: {}]   ;;  %s4875_s6 = inlined_call_operand.hbm [shape: f32[6,32,128], index: 6, kind: output, shape index: {}]  }
   0x1   :  { %4879 = sst [smem:[#allocation30_spill]] %s4869_s0 }
   0x2   :  { %4880 = sst [smem:[#allocation31_spill]] %s4872_s3 }
   0x3   :  { %4881 = sst [smem:[#allocation32_spill]] %s4873_s4 }
   0x4   :  { %11 = vsyncpa [#allocation3], 0 }
   0x5   :  { %13 = vsyncpa [#allocation3 + $0x1], 0 }
   0x6   :  { %14 = vsyncpa [#allocation6], 0 }
   0x7   :  { %16 = vsyncpa [#allocation6 + $0x1], 0 }
   0x8   :  { %17 = vsyncpa [#allocation9], 0 }
   0x9   :  { %18 = vsyncpa [#allocation12], 0 }
   0xa   :  { %19 = vsyncpa [#allocation4], 0 }
   0xb   :  { %21 = vsyncpa [#allocation4 + $0x1], 0  ;;  %s4333_s21 = smov 0   ;;  %s4335_s22 = smov 0  }
   0xc   :  { %s4337_s23 = smov 0   ;;  %s4339_s24 = smov 0  }
   0xd LB: > { %s4354_s25 = sadd.s32 4294967295, %s4263_s24   ;;  %s2910_s26 = sadd.s32 4294967294, %s4263_s24   ;;  %s4263_s24 = sphi %s4339_s24, %s4901_s24   ;;  %s4259_s23 = sphi %s4337_s23, %s4900_s23   ;;  %s4255_s22 = sphi %s4335_s22, %s4899_s22   ;;  %s4251_s21 = sphi %s4333_s21, %s4898_s21  }
   0xe   : > { %s4358_s27 = sadd.s32 1, %s4263_s24   ;;  %s34_s28 = sadd.s32 1, %s4259_s23 }
   0xf   : > { %s31_s29 = ssub.s32 %s4263_s24, %s4358_s27  ;;  %p41_p0 = scmp.ne.s32.totalorder %s4259_s23, %s4255_s22 }
  0x10   : > { %p32_p1 = scmp.eq.s32.totalorder %s31_s29, 0  ;;  %p42_p2 = scmp.eq.s32.totalorder %s4263_s24, 0 }
  0x11   : > { %p47_p3 = scmp.ne.s32.totalorder %s4255_s22, %s4251_s21  ;;  %p4876_p4 = scmp.eq.s32.totalorder %s4354_s25, 0 }
  0x12   : > { %s4370_s30 = scalar_select %p32_p1, %s4259_s23, %s34_s28  }
  0x13   : > { %p4372_p5 = por %p42_p2, %p41_p0  ;;  %p4378_p6 = por %p4876_p4, %p47_p3 }
  0x14   : > { %p186_p7 = scmp.eq.s32.totalorder %s4354_s25, 1  ;;  %p192_p8 = scmp.eq.s32.totalorder %s2910_s26, 1 }
  0x15   : > { %s4883_s8 = scalar_select %p4378_p6, 1, 0 }
  0x16   : > { %p2911_p9 = scmp.ge.s32.totalorder %s4263_s24, 1  ;;  %p199_p10 = scmp.lt.s32.totalorder %s4263_s24, 3 }
  0x17   : > { %p4385_p11 = por %p186_p7, %p41_p0  ;;  %p4389_p12 = por %p192_p8, %p47_p3 }
  0x18   : > { %p4393_p13 = pnand %p2911_p9, %p199_p10  ;;  %s4265_s12 = smov [#allocation8]  }
  0x19   : > { %s4884_s9 = scalar_select %p4385_p11, 1, 0 }
  0x1a   : > { %s4885_s10 = scalar_select %p4389_p12, 1, 0 }
  0x1b   : > { %p3785_p1 = pneg %p4393_p13  ;;  %s211_s13 = sshll.u32 %s4265_s12, 4  ;;  %s212_s13 = int_to_ptr.vmem [resolvable:$true] %s211_s13 }
  0x1c   : > { %s4266_s15 = smov [#allocation10]   ;;  %s4146_s17 = scalar_lea.vmem %s212_s13, 1024 }
  0x1d   : > { %p4401_p2 = pnand %p3785_p1, %p4876_p4  ;;  %s224_s16 = sshll.u32 %s4266_s15, 4  ;;  %s225_s16 = int_to_ptr.vmem [resolvable:$true] %s224_s16 }
  0x1e   : > { %p4147_p3 = scmp.ne.s32.totalorder %s212_s13, %s4146_s17  ;;  %p4154_p9 = scmp.lt.s32.totalorder %s212_s13, %s212_s13 }
  0x1f   : > { %p4137_p0 = pneg %p4401_p2  ;;  %p4155_p10 = scmp.lt.s32.totalorder %s4146_s17, %s4146_s17 }
  0x21   : > { %p4149_p7 = pnand %p4147_p3, %p4137_p0  ;;  %p4156_p12 = por %p4155_p10, %p4154_p9 }
  0x23   : > { %p4150_p8 = pneg %p4149_p7 }
  0x25   : > { %p4157_p1 = pnand %p4156_p12, %p4150_p8 }
  0x27   : > { %4160 = shalt.err (!%p4157_p1)
}
  0x28   : > { %s4267_s18 = smov 64   ;;  %s4268_s19 = smov 4  }
  0x29   : > { %s4888_s3 = sld [smem:[#allocation31_spill]]  ;;  %s4172_s28 = scalar_lea.vmem %s225_s16, 1024 }
  0x2a   : > { %p4173_p4 = scmp.ne.s32.totalorder %s225_s16, %s4172_s28  ;;  %p4180_p11 = scmp.lt.s32.totalorder %s225_s16, %s225_s16 }
  0x2b   : > { %p4181_p6 = scmp.lt.s32.totalorder %s4172_s28, %s4172_s28 }
  0x2c   : > { %p4175_p3 = pnand %p4173_p4, %p4137_p0 }
  0x2d   : > { %p4182_p9 = por %p4181_p6, %p4180_p11 }
  0x2e   : > { %p4176_p7 = pneg %p4175_p3 }
  0x2f   : > { %3788 = dma.hbm_to_vmem [thread:$0]  (!%p4401_p2), %s4888_s3, 1024, %s212_s13, [#allocation9], %s4267_s18, %s4267_s18, %s4268_s19  }
  0x30   : > { %p4183_p12 = pnand %p4182_p9, %p4176_p7 }
  0x32   : > { %4186 = shalt.err (!%p4183_p12)
}
  0x33   : > { %s4889_s4 = sld [smem:[#allocation32_spill]]  ;;  %s4269_s15 = smov [#allocation11]  }
  0x34   : > { %s237_s13 = sshll.u32 %s4269_s15, 4  ;;  %s238_s13 = int_to_ptr.vmem [resolvable:$true] %s237_s13 }
  0x35   : > { %s4198_s17 = scalar_lea.vmem %s238_s13, 1024  ;;  %p4206_p1 = scmp.lt.s32.totalorder %s238_s13, %s238_s13 }
  0x36   : > { %p4199_p8 = scmp.ne.s32.totalorder %s238_s13, %s4198_s17  ;;  %p4207_p6 = scmp.lt.s32.totalorder %s4198_s17, %s4198_s17 }
  0x38   : > { %p4201_p4 = pnand %p4199_p8, %p4137_p0  ;;  %p4208_p11 = por %p4207_p6, %p4206_p1 }
  0x39   : > { %3791 = dma.hbm_to_vmem [thread:$0]  (!%p4401_p2), %s4889_s4, 1024, %s225_s16, [#allocation9], %s4267_s18, %s4267_s18, %s4268_s19  }
  0x3a   : > { %p4202_p10 = pneg %p4201_p4 }
  0x3c   : > { %p4209_p3 = pnand %p4208_p11, %p4202_p10 }
  0x3e   : > { %4212 = shalt.err (!%p4209_p3)
}
  0x3f   : > { %3794 = dma.hbm_to_vmem [thread:$0]  (!%p4401_p2), %s4874_s5, 1024, %s238_s13, [#allocation12], %s4267_s18, %s4267_s18, %s4268_s19  }
  0x40   : > { %p2915_p7 = scmp.ge.s32.totalorder %s4263_s24, 2 }
  0x42   : > { %247 = sbr.rel (%p2915_p7) target bundleno = 109 (0x6d), region = 28 }
  0x47   : > { %s251_s16 = sand.u32 1, %s4259_s23   ;;  %s4438_s14 = sshll.u32 %s4263_s24, 7 }
  0x48   : > { %s4435_s28 = smul.u32 48, %s251_s16  ;;  %s4270_s18 = smov 256  }
  0x49   : > { %3745 = sst [smem:[#allocation15]] (%p4372_p5), %s4270_s18  ;;  %s4271_s26 = smov 128  }
  0x4a   : > { %s3744_s19 = scalar_select %p4372_p5, [#allocation0], [#allocation22] }
  0x4b   : > { %s4890_s0 = sld [smem:[#allocation30_spill]]  ;;  %s255_s17 = scalar_lea.vmem [#allocation2], %s4435_s28 }
  0x4c   : > { %s266_s13 = sld [smem:[%s3744_s19]]   ;;  %s274_s20 = sshll.u32 %s255_s17, 4  ;;  %s275_s20 = int_to_ptr.vmem [resolvable:$true] %s274_s20 }
  0x4d   : > { %3746 = sst [smem:[#allocation15 + $0x1]] (%p4372_p5), %s4271_s26  ;;  %s4272_s3 = smov 2  }
  0x4e   : > { %3747 = sst [smem:[#allocation15 + $0x2]] (%p4372_p5), %s4272_s3  ;;  %s4273_s4 = smov 64  }
  0x4f   : > { %3748 = sst [smem:[#allocation15 + $0x3]] (%p4372_p5), %s4273_s4  ;;  %s4274_s18 = smov 4  }
  0x50   : > { %3749 = sst [smem:[#allocation15 + $0x4]] (%p4372_p5), %s4273_s4  ;;  %s252_s12 = scalar_lea.sflag [#allocation3], %s251_s16 }
  0x51   : > { %s261_s15 = scalar_lea.hbm %s4890_s0, %s4438_s14  ;;  %3750 = sst [smem:[#allocation15 + $0x5]] (%p4372_p5), %s4274_s18 }
  0x52   : > { %s2918_s29 = sshll.u32 %s266_s13, 26  ;;  %s4275_s0 = smov 131072  }
  0x53   : > { %s2919_s19 = sadd.s32 134217728, %s2918_s29 }
  0x54   : > { %3751 = dma.general (%p4372_p5), %s261_s15, 768, %s275_s20, %s252_s12, %s4275_s0, [#allocation15], %s2919_s19, 0  }
  0x55   : > { %s297_s3 = sand.u32 1, %s4263_s24   ;;  %s307_s26 = scalar_lea.hbm %s4870_s1, %s4438_s14 }
  0x56   : > { %s3752_s13 = scalar_select %p4372_p5, [#allocation0], [#allocation23] }
  0x57   : > { %s301_s16 = scalar_lea.vmem [#allocation5], %s4435_s28  ;;  %s4276_s15 = smov 256  }
  0x58   : > { %s320_s18 = sshll.u32 %s301_s16, 4  ;;  %s312_s0 = sld [smem:[%s3752_s13]]   ;;  %s321_s18 = int_to_ptr.vmem [resolvable:$true] %s320_s18 }
  0x59   : > { %3753 = sst [smem:[#allocation17]] (%p4372_p5), %s4276_s15  ;;  %s4277_s20 = smov 128  }
  0x5a   : > { %3754 = sst [smem:[#allocation17 + $0x1]] (%p4372_p5), %s4277_s20  ;;  %s4278_s29 = smov 2  }
  0x5b   : > { %3755 = sst [smem:[#allocation17 + $0x2]] (%p4372_p5), %s4278_s29  ;;  %s4279_s19 = smov 64  }
  0x5c   : > { %3756 = sst [smem:[#allocation17 + $0x3]] (%p4372_p5), %s4279_s19  ;;  %s4280_s4 = smov 4  }
  0x5d   : > { %3757 = sst [smem:[#allocation17 + $0x4]] (%p4372_p5), %s4279_s19  ;;  %s298_s13 = scalar_lea.sflag [#allocation6], %s297_s3 }
  0x5e   : > { %s2922_s12 = sshll.u32 %s312_s0, 26  ;;  %3758 = sst [smem:[#allocation17 + $0x5]] (%p4372_p5), %s4280_s4 }
  0x5f   : > { %s2923_s17 = sadd.s32 134217728, %s2922_s12  ;;  %s4281_s16 = smov 131072  }
  0x60   : > { %3759 = dma.general (%p4372_p5), %s307_s26, 768, %s321_s18, %s298_s13, %s4281_s16, [#allocation17], %s2923_s17, 0  }
  0x61   : > { %s353_s0 = scalar_lea.hbm %s4871_s2, %s4438_s14  ;;  %s347_s19 = scalar_lea.vmem [#allocation7], %s4435_s28 }
  0x62   : > { %s3760_s29 = scalar_select %p4372_p5, [#allocation0], [#allocation24] }
  0x63   : > { %s366_s3 = sshll.u32 %s347_s19, 4  ;;  %s4282_s26 = smov 256   ;;  %s367_s3 = int_to_ptr.vmem [resolvable:$true] %s366_s3 }
  0x64   : > { %s358_s12 = sld [smem:[%s3760_s29]]   ;;  %s4283_s18 = smov 128  }
  0x65   : > { %3761 = sst [smem:[#allocation19]] (%p4372_p5), %s4282_s26  ;;  %s4284_s4 = smov 2  }
  0x66   : > { %3762 = sst [smem:[#allocation19 + $0x1]] (%p4372_p5), %s4283_s18  ;;  %s4285_s17 = smov 64  }
  0x67   : > { %3763 = sst [smem:[#allocation19 + $0x2]] (%p4372_p5), %s4284_s4  ;;  %s4286_s28 = smov 4  }
  0x68   : > { %3764 = sst [smem:[#allocation19 + $0x3]] (%p4372_p5), %s4285_s17  ;;  %s4287_s15 = smov 131072  }
  0x69   : > { %3765 = sst [smem:[#allocation19 + $0x4]] (%p4372_p5), %s4285_s17 }
  0x6a   : > { %s2926_s14 = sshll.u32 %s358_s12, 26  ;;  %3766 = sst [smem:[#allocation19 + $0x5]] (%p4372_p5), %s4286_s28 }
  0x6b   : > { %s2927_s16 = sadd.s32 134217728, %s2926_s14 }
  0x6c   : > { %3767 = dma.general (%p4372_p5), %s353_s0, 768, %s367_s3, %s298_s13, %s4287_s15, [#allocation19], %s2927_s16, 0  }
  0x6d PF: > { %391 = sbr.rel (%p4393_p13) target bundleno = 2904 (0xb58), region = 44  ;;  %s4507_s20 = sand.u32 (!%p4393_p13), 1, %s4255_s22  }
  0x6e   : > { %s3736_s29 = smul.u32 (!%p4393_p13), 48, %s4507_s20  ;;  %s394_s19 = scalar_lea.sflag (!%p4393_p13), [#allocation3], %s4507_s20 }
  0x6f   : > { %p4891_p2 = scmp.ne.s32.totalorder (!%p4393_p13), %s4883_s8, 0 }
  0x70   : > { %s4511_s12 = scalar_lea.vmem (!%p4393_p13), [#allocation2], %s3736_s29 }
  0x72   : > { %4230 = dma.done.wait (%p4891_p2), %s394_s19, 768  }
  0x73   : > { %4232 = vsyncadd (%p4891_p2), %s394_s19, 4294966528  ;;  %s402_s7 = sand.u32 1, %s4354_s25   ;;  %s4518_s13 = scalar_lea.vmem [#allocation5], %s3736_s29 }
  0x74   : > { %s403_s11 = scalar_lea.sflag [#allocation6], %s402_s7 }
  0x75   : > { %4234 = dma.done.wait (%p4891_p2), %s403_s11, 1536  }
  0x76   : > { %4236 = vsyncadd (%p4891_p2), %s403_s11, 4294965760  ;;  %s4524_s0 = scalar_lea.vmem [#allocation7], %s3736_s29  ;;  %p4892_p5 = scmp.eq.s32.totalorder %s4354_s25, 0 }
  0x78   : > { %4238 = dma.done.wait (%p4892_p5), [#allocation9], 2048   ;;  %p4893_p13 = pmov %p4892_p5 }
  0x79   : > { %p4894_p0 = pmov %p4892_p5 }
  0x7a   : > { %4240 = vsyncadd (%p4893_p13), [#allocation9], 4294965248 }
  0x7b   : > { %4242 = dma.done.wait (%p4894_p0), [#allocation12], 1024   ;;  %p4895_p9 = pmov %p4894_p0 }
  0x7c   : > { %v4288_v0 = vmov 0.0   ;;  %vm4289_vm0 = vmmov 0   ;;  %v3871_v1 = vld [vmem:[#allocation8 + $0x38] sm:$0xff]   ;;  %v3872_v2 = vld [vmem:[#allocation8 + $0x30] sm:$0xff]   ;;  %v3873_v3 = vld [vmem:[#allocation8 + $0x28] sm:$0xff]   ;;  %v4290_v13 = vmov 0  }
  0x7d   : > { %4244 = vsyncadd (%p4895_p9), [#allocation12], 4294966272  ;;  %3373 = vmatprep.subr.bf16.mxu0 %v4288_v0  ;;  %3389 = vmatprep.mubr.msk.bf16.mxu0 %vm4289_vm0, %v4288_v0  ;;  %v3879_v4 = vld [vmem:[#allocation10 + $0x38] sm:$0xff]   ;;  %v3874_v5 = vld [vmem:[#allocation8 + $0x20] sm:$0xff]   ;;  %s3737_s8 = smul.u32 96, %s4507_s20  ;;  %s2729_s26 = scalar_lea.sflag [#allocation4], %s4507_s20 }
  0x7e   : > { %3393 = vmatprep.subr.bf16.mxu1 %v4288_v0  ;;  %3409 = vmatprep.mubr.msk.bf16.mxu1 %vm4289_vm0, %v4288_v0  ;;  %v3880_v6 = vld [vmem:[#allocation10 + $0x30] sm:$0xff]   ;;  %v3875_v7 = vld [vmem:[#allocation8 + $0x18] sm:$0xff]   ;;  %v3881_v8 = vld [vmem:[#allocation10 + $0x28] sm:$0xff]  }
  0x7f   : > { %3374 = vmatpush3.bf16.msra.mxu0 %v3871_v1  ;;  %3394 = vmatpush3.bf16.msra.mxu1 %v3879_v4  ;;  %v3876_v9 = vld [vmem:[#allocation8 + $0x10] sm:$0xff]   ;;  %v3882_v10 = vld [vmem:[#allocation10 + $0x20] sm:$0xff]   ;;  %v3877_v11 = vld [vmem:[#allocation8 + $0x8] sm:$0xff]   ;;  %s4592_s3 = scalar_lea.vmem [#allocation13], %s3737_s8 }
  0x80   : > { %3375 = vmatprep.subr.bf16.mxu0 %v4288_v0  ;;  %3395 = vmatprep.subr.bf16.mxu1 %v4288_v0  ;;  %v3878_v12 = vld [vmem:[#allocation8] sm:$0xff]   ;;  %v3883_v14 = vld [vmem:[#allocation10 + $0x18] sm:$0xff]   ;;  %v3884_v15 = vld [vmem:[#allocation10 + $0x10] sm:$0xff]  }
  0x81   : > { %v3885_v16 = vld [vmem:[#allocation10 + $0x8] sm:$0xff]   ;;  %v3886_v17 = vld [vmem:[#allocation10] sm:$0xff]   ;;  %v3887_v18 = vld [vmem:[#allocation11 + $0x38] sm:$0xff]  }
  0x82   : > { %v3888_v19 = vld [vmem:[#allocation11 + $0x30] sm:$0xff]   ;;  %v3889_v20 = vld [vmem:[#allocation11 + $0x28] sm:$0xff]   ;;  %v3890_v21 = vld [vmem:[#allocation11 + $0x20] sm:$0xff]  }
  0x83   : > { %3376 = vmatpush3.bf16.msra.mxu0 %v3872_v2  ;;  %3396 = vmatpush3.bf16.msra.mxu1 %v3880_v6  ;;  %v3891_v22 = vld [vmem:[#allocation11 + $0x18] sm:$0xff]   ;;  %v3892_v23 = vld [vmem:[#allocation11 + $0x10] sm:$0xff]   ;;  %v3893_v24 = vld [vmem:[#allocation11 + $0x8] sm:$0xff]  }
  0x84   : > { %3377 = vmatprep.subr.bf16.mxu0 %v4288_v0  ;;  %3397 = vmatprep.subr.bf16.mxu1 %v4288_v0  ;;  %v3894_v25 = vld [vmem:[#allocation11] sm:$0xff]   ;;  %v3895_v26 = vld [vmem:[#allocation8 + $0x38] sm:$0xff]   ;;  %v3897_v54 = vld [vmem:[#allocation8 + $0x30] sm:$0xff]  }
  0x85   : > { %v3125_v27 = vld [vmem:[%s4511_s12] sm:$0xff]   ;;  %v3896_v48 = vld [vmem:[#allocation10 + $0x38] sm:$0xff]   ;;  %v3899_v56 = vld [vmem:[#allocation8 + $0x28] sm:$0xff]  }
  0x86   : > { %v3126_v28 = vunpack.c.l.bf16 %v3125_v27  ;;  %v3127_v31 = vunpack.c.h.bf16 %v3125_v27  ;;  %v3898_v55 = vld [vmem:[#allocation10 + $0x30] sm:$0xff]   ;;  %v3900_v57 = vld [vmem:[#allocation10 + $0x28] sm:$0xff]   ;;  %v3901_v58 = vld [vmem:[#allocation8 + $0x20] sm:$0xff]  }
  0x87   : > { %3378 = vmatpush3.bf16.msra.mxu0 %v3873_v3  ;;  %3398 = vmatpush3.bf16.msra.mxu1 %v3881_v8  ;;  %v3902_v59 = vld [vmem:[#allocation10 + $0x20] sm:$0xff]   ;;  %v3903_v60 = vld [vmem:[#allocation8 + $0x18] sm:$0xff]   ;;  %v3905_v62 = vld [vmem:[#allocation8 + $0x10] sm:$0xff]  }
  0x88   : > { %3379 = vmatprep.subr.bf16.mxu0 %v4288_v0  ;;  %3399 = vmatprep.subr.bf16.mxu1 %v4288_v0  ;;  %v3904_v61 = vld [vmem:[#allocation10 + $0x18] sm:$0xff]   ;;  %v3906_v63 = vld [vmem:[#allocation10 + $0x10] sm:$0xff]   ;;  %v3907_v1 = vld [vmem:[#allocation8 + $0x8] sm:$0xff]  }
  0x89   : > { %v3908_v2 = vld [vmem:[#allocation10 + $0x8] sm:$0xff]   ;;  %v3909_v3 = vld [vmem:[#allocation8] sm:$0xff]  }
  0x8a   : > { %v3910_v4 = vld [vmem:[#allocation10] sm:$0xff]  }
  0x8b   : > { %3380 = vmatpush3.bf16.msra.mxu0 %v3874_v5  ;;  %3400 = vmatpush3.bf16.msra.mxu1 %v3882_v10  ;;  %v3129_v5 = vld [vmem:[%s4518_s13] sm:$0xff]  }
  0x8c   : > { %3381 = vmatprep.subr.bf16.mxu0 %v4288_v0  ;;  %3401 = vmatprep.subr.bf16.mxu1 %v4288_v0  ;;  %v3130_v6 = vunpack.c.l.bf16 %v3129_v5  ;;  %v3131_v8 = vunpack.c.h.bf16 %v3129_v5 }
  0x8f   : > { %3382 = vmatpush3.bf16.msra.mxu0 %v3875_v7  ;;  %3402 = vmatpush3.bf16.msra.mxu1 %v3883_v14 }
  0x90   : > { %3383 = vmatprep.subr.bf16.mxu0 %v4288_v0  ;;  %3403 = vmatprep.subr.bf16.mxu1 %v4288_v0 }
  0x93   : > { %3384 = vmatpush3.bf16.msra.mxu0 %v3876_v9  ;;  %3404 = vmatpush3.bf16.msra.mxu1 %v3884_v15 }
  0x94   : > { %3385 = vmatprep.subr.bf16.mxu0 %v4288_v0  ;;  %3405 = vmatprep.subr.bf16.mxu1 %v4288_v0 }
  0x97   : > { %3386 = vmatpush3.bf16.msra.mxu0 %v3877_v11  ;;  %3406 = vmatpush3.bf16.msra.mxu1 %v3885_v16  ;;  %v3133_v16 = vld [vmem:[%s4524_s0] sm:$0xff]  }
  0x98   : > { %3387 = vmatprep.subr.bf16.mxu0 %v4288_v0  ;;  %3407 = vmatprep.subr.bf16.mxu1 %v4288_v0 }
  0x9b   : > { %3388 = vmatpush3.bf16.msra.mxu0 %v3878_v12  ;;  %3408 = vmatpush3.bf16.msra.mxu1 %v3886_v17 }
  0x9c   : > { %3413 = vmatprep.subr.bf16.mxu0 %v4288_v0  ;;  %3433 = vmatprep.subr.bf16.mxu1 %v4288_v0 }
  0x9e   : > { %3390 = vmatmul.mubr.bf16.vlgmr.msra.gmra.mxu0 %v4290_v13  ;;  %3410 = vmatmul.mubr.bf16.vlgmr.msra.gmra.mxu1 %v4290_v13 }
  0x9f   : > { %3429 = vmatprep.mubr.msk.bf16.mxu0 %vm4289_vm0, %v4288_v0  ;;  %3414 = vmatpush3.bf16.msra.mxu0 %v3887_v18  ;;  %v3134_v18 = vunpack.c.l.bf16 %v3133_v16 }
  0xa0   : > { %3415 = vmatprep.subr.bf16.mxu0 %v4288_v0  ;;  %3449 = vmatprep.mubr.msk.bf16.mxu1 %vm4289_vm0, %v4288_v0 }
  0xa1   : > { %3434 = vmatpush3.bf16.msra.mxu1 %v3895_v26 }
  0xa2   : > { %3435 = vmatprep.subr.bf16.mxu1 %v4288_v0 }
  0xa3   : > { %3416 = vmatpush3.bf16.msra.mxu0 %v3888_v19 }
  0xa4   : > { %3417 = vmatprep.subr.bf16.mxu0 %v4288_v0 }
  0xa5   : > { %3436 = vmatpush3.bf16.msra.mxu1 %v3897_v54 }
  0xa6   : > { %3437 = vmatprep.subr.bf16.mxu1 %v4288_v0 }
  0xa7   : > { %3418 = vmatpush3.bf16.msra.mxu0 %v3889_v20 }
  0xa8   : > { %3419 = vmatprep.subr.bf16.mxu0 %v4288_v0 }
  0xa9   : > { %3438 = vmatpush3.bf16.msra.mxu1 %v3899_v56 }
  0xaa   : > { %3439 = vmatprep.subr.bf16.mxu1 %v4288_v0 }
  0xab   : > { %3420 = vmatpush3.bf16.msra.mxu0 %v3890_v21 }
  0xac   : > { %3421 = vmatprep.subr.bf16.mxu0 %v4288_v0 }
  0xad   : > { %3440 = vmatpush3.bf16.msra.mxu1 %v3901_v58 }
  0xae   : > { %3441 = vmatprep.subr.bf16.mxu1 %v4288_v0 }
  0xaf   : > { %3422 = vmatpush3.bf16.msra.mxu0 %v3891_v22  ;;  %v3135_v22 = vunpack.c.h.bf16 %v3133_v16  ;;  %v3924_v16 = vld [vmem:[#allocation10 + $0x28] sm:$0xff]  }
  0xb0   : > { %3423 = vmatprep.subr.bf16.mxu0 %v4288_v0 }
  0xb1   : > { %3442 = vmatpush3.bf16.msra.mxu1 %v3903_v60 }
  0xb2   : > { %3443 = vmatprep.subr.bf16.mxu1 %v4288_v0 }
  0xb3   : > { %3424 = vmatpush3.bf16.msra.mxu0 %v3892_v23 }
  0xb4   : > { %3425 = vmatprep.subr.bf16.mxu0 %v4288_v0 }
  0xb5   : > { %3444 = vmatpush3.bf16.msra.mxu1 %v3905_v62 }
  0xb6   : > { %3445 = vmatprep.subr.bf16.mxu1 %v4288_v0 }
  0xb7   : > { %3426 = vmatpush3.bf16.msra.mxu0 %v3893_v24 }
  0xb8   : > { %3427 = vmatprep.subr.bf16.mxu0 %v4288_v0 }
  0xb9   : > { %3446 = vmatpush3.bf16.msra.mxu1 %v3907_v1 }
  0xba   : > { %3447 = vmatprep.subr.bf16.mxu1 %v4288_v0 }
  0xbb   : > { %3428 = vmatpush3.bf16.msra.mxu0 %v3894_v25 }
  0xbc   : > { %3453 = vmatprep.subr.bf16.mxu0 %v4288_v0 }
  0xbd   : > { %3448 = vmatpush3.bf16.msra.mxu1 %v3909_v3 }
  0xbe   : > { %3473 = vmatprep.subr.bf16.mxu1 %v4288_v0 }
 0x15e   : > { %v569_v29 = vpop.f32.mrf.mxu0  ;;  %v674_v50 = vpop.f32.mrf.mxu1 }
 0x15f   : > { %v685_v30 = vadd.f32 %v3126_v28, %v569_v29  ;;  %v811_v7 = vadd.f32 %v3130_v6, %v674_v50 }
 0x160   : > { %v3391_v32 = vpop.f32.mrf.mxu0  ;;  %v3411_v51 = vpop.f32.mrf.mxu1 }
 0x161   : > { %v687_v33 = vsub.f32 0.0, %v685_v30  ;;  %v813_v9 = vsub.f32 0.0, %v811_v7 }
 0x162   : > { %v572_v34 = vpop.f32.mrf.mxu0  ;;  %v677_v52 = vpop.f32.mrf.mxu1 }
 0x163   : > { %v689_v35 = vmul.f32 1.442695, %v687_v33  ;;  %v686_v36 = vadd.f32 %v3127_v31, %v572_v34  ;;  %v812_v10 = vadd.f32 %v3131_v8, %v677_v52  ;;  %v815_v11 = vmul.f32 1.442695, %v813_v9 }
 0x164   : > { %v3392_v37 = vpop.f32.mrf.mxu0  ;;  %v3412_v53 = vpop.f32.mrf.mxu1 }
 0x165   : > { %4015 = vpow2.f32 %v689_v35  ;;  %v688_v38 = vsub.f32 0.0, %v686_v36  ;;  %v814_v12 = vsub.f32 0.0, %v812_v10 }
 0x167   : > { %v691_v39 = vmul.f32 1.442695, %v688_v38  ;;  %v817_v13 = vmul.f32 1.442695, %v814_v12 }
 0x169   : > { %4017 = vpow2.f32 %v691_v39 }
 0x172   : > { %v4016_v40 = vpop.eup %4015 }
 0x173   : > { %v693_v41 = vadd.f32 1.0, %v4016_v40  ;;  %v3911_v40 = vld [vmem:[#allocation11 + $0x38] sm:$0xff]  }
 0x175   : > { %4019 = vrcp.f32 %v693_v41  ;;  %v3912_v41 = vld [vmem:[#allocation11 + $0x30] sm:$0xff]  }
 0x176   : > { %v4018_v42 = vpop.eup %4017 }
 0x177   : > { %v694_v43 = vadd.f32 1.0, %v4018_v42  ;;  %v3913_v42 = vld [vmem:[#allocation11 + $0x28] sm:$0xff]  }
 0x179   : > { %4021 = vrcp.f32 %v694_v43  ;;  %v3914_v43 = vld [vmem:[#allocation11 + $0x20] sm:$0xff]  }
 0x17a   : > { %4023 = vpow2.f32 %v815_v11  ;;  %v3920_v11 = vld [vmem:[#allocation10 + $0x38] sm:$0xff]  }
 0x17b   : > { %4025 = vpow2.f32 %v817_v13  ;;  %v3921_v13 = vld [vmem:[#allocation8 + $0x30] sm:$0xff]  }
 0x182   : > { %v4020_v44 = vpop.eup %4019 }
 0x183   : > { %v699_v46 = vmul.f32 0.0, %v4020_v44  ;;  %v3915_v44 = vld [vmem:[#allocation11 + $0x18] sm:$0xff]  }
 0x186   : > { %v4022_v45 = vpop.eup %4021 }
 0x187   : > { %v700_v47 = vmul.f32 0.0, %v4022_v45  ;;  %v4024_v14 = vpop.eup %4023  ;;  %v3916_v45 = vld [vmem:[#allocation11 + $0x10] sm:$0xff]  }
 0x188   : > { %v819_v15 = vadd.f32 1.0, %v4024_v14  ;;  %v4026_v17 = vpop.eup %4025  ;;  %v3922_v14 = vld [vmem:[#allocation10 + $0x30] sm:$0xff]  }
 0x189   : > { %v701_v49 = vpack.c.bf16 %v700_v47, %v699_v46  ;;  %v820_v19 = vadd.f32 1.0, %v4026_v17  ;;  %v3917_v46 = vld [vmem:[#allocation11 + $0x8] sm:$0xff]   ;;  %v3918_v47 = vld [vmem:[#allocation11] sm:$0xff]  }
 0x18a   : > { %4027 = vrcp.f32 %v819_v15  ;;  %v3923_v15 = vld [vmem:[#allocation8 + $0x28] sm:$0xff]   ;;  %v3925_v17 = vld [vmem:[#allocation8 + $0x20] sm:$0xff]  }
 0x18b   : > { %3430 = vmatmul.mubr.bf16.vlgmr.msra.gmra.mxu0 %v701_v49  ;;  %4029 = vrcp.f32 %v820_v19  ;;  %v3196_v49 = vld [vmem:[%s4511_s12 + $0x8] sm:$0xff]  }
 0x18c   : > { %3454 = vmatpush3.bf16.msra.mxu0 %v3896_v48  ;;  %3469 = vmatprep.mubr.msk.bf16.mxu0 %vm4289_vm0, %v4288_v0  ;;  %v3919_v48 = vld [vmem:[#allocation8 + $0x38] sm:$0xff]   ;;  %v3138_v50 = vunpack.c.l.bf16 %v3196_v49  ;;  %v3139_v54 = vunpack.c.h.bf16 %v3196_v49 }
 0x18d   : > { %3455 = vmatprep.subr.bf16.mxu0 %v4288_v0  ;;  %v3927_v19 = vld [vmem:[#allocation8 + $0x18] sm:$0xff]  }
 0x190   : > { %3456 = vmatpush3.bf16.msra.mxu0 %v3898_v55 }
 0x191   : > { %3457 = vmatprep.subr.bf16.mxu0 %v4288_v0 }
 0x194   : > { %3458 = vmatpush3.bf16.msra.mxu0 %v3900_v57 }
 0x195   : > { %3459 = vmatprep.subr.bf16.mxu0 %v4288_v0 }
 0x197   : > { %v4028_v27 = vpop.eup %4027 }
 0x198   : > { %3460 = vmatpush3.bf16.msra.mxu0 %v3902_v59  ;;  %v835_v28 = vsub.f32 1.0, %v4028_v27  ;;  %v4030_v29 = vpop.eup %4029  ;;  %v833_v32 = vmul.f32 0.0, %v4028_v27  ;;  %v3197_v27 = vld [vmem:[%s4518_s13 + $0x8] sm:$0xff]  }
 0x199   : > { %3461 = vmatprep.subr.bf16.mxu0 %v4288_v0  ;;  %v836_v33 = vsub.f32 1.0, %v4030_v29  ;;  %v834_v37 = vmul.f32 0.0, %v4030_v29  ;;  %v3143_v29 = vunpack.c.h.bf16 %v3197_v27 }
 0x19c   : > { %3462 = vmatpush3.bf16.msra.mxu0 %v3904_v61 }
 0x19d   : > { %3463 = vmatprep.subr.bf16.mxu0 %v4288_v0 }
 0x1a0   : > { %3464 = vmatpush3.bf16.msra.mxu0 %v3906_v63 }
 0x1a1   : > { %3465 = vmatprep.subr.bf16.mxu0 %v4288_v0 }
 0x1a4   : > { %3466 = vmatpush3.bf16.msra.mxu0 %v3908_v2 }
 0x1a5   : > { %3467 = vmatprep.subr.bf16.mxu0 %v4288_v0 }
 0x1a8   : > { %3468 = vmatpush3.bf16.msra.mxu0 %v3910_v4 }
 0x1a9   : > { %3493 = vmatprep.subr.bf16.mxu0 %v4288_v0 }
 0x24b   : > { %v800_v20 = vpop.f32.mrf.mxu0 }
 0x24c   : > { %v829_v21 = vadd.f32 %v3134_v18, %v800_v20  ;;  %v3926_v18 = vld [vmem:[#allocation10 + $0x20] sm:$0xff]   ;;  %v3928_v20 = vld [vmem:[#allocation10 + $0x18] sm:$0xff]  }
 0x24d   : > { %v3431_v23 = vpop.f32.mrf.mxu0 }
 0x24e   : > { %4031 = vtanh.f32 %v829_v21  ;;  %v3929_v21 = vld [vmem:[#allocation8 + $0x10] sm:$0xff]   ;;  %v3931_v23 = vld [vmem:[#allocation8 + $0x8] sm:$0xff]  }
 0x24f   : > { %v803_v24 = vpop.f32.mrf.mxu0 }
 0x250   : > { %v830_v25 = vadd.f32 %v3135_v22, %v803_v24  ;;  %v3930_v22 = vld [vmem:[#allocation10 + $0x10] sm:$0xff]   ;;  %v3932_v24 = vld [vmem:[#allocation10 + $0x8] sm:$0xff]  }
 0x251   : > { %v3432_v26 = vpop.f32.mrf.mxu0 }
 0x252   : > { %4033 = vtanh.f32 %v830_v25  ;;  %v3933_v25 = vld [vmem:[#allocation8] sm:$0xff]  }
 0x253   : > { %v3934_v26 = vld [vmem:[#allocation10] sm:$0xff]  }
 0x25b   : > { %v4032_v30 = vpop.eup %4031 }
 0x25c   : > { %v837_v31 = vmul.f32 %v4032_v30, %v835_v28  ;;  %v3142_v28 = vunpack.c.l.bf16 %v3197_v27 }
 0x25e   : > { %v4590_v34 = vadd.f32 %v837_v31, %v833_v32 }
 0x25f   : > { %v4034_v35 = vpop.eup %4033 }
 0x260   : > { %v838_v36 = vmul.f32 %v4034_v35, %v836_v33  ;;  %841 = vst [vmem:[%s4592_s3] sm:$0xff] %v4590_v34 }
 0x262   : > { %v4596_v38 = vadd.f32 %v838_v36, %v834_v37 }
 0x264   : > { %842 = vst [vmem:[%s4592_s3 + $0x8] sm:$0xff] %v4596_v38  ;;  %v843_v39 = vpack.c.bf16 %v4596_v38, %v4590_v34 }
 0x266   : > { %3450 = vmatmul.mubr.bf16.vlgmr.msra.gmra.mxu1 %v843_v39  ;;  %3470 = vmatmul.mubr.bf16.vlgmr.msra.gmra.mxu0 %v843_v39  ;;  %v3198_v39 = vld [vmem:[%s4524_s0 + $0x8] sm:$0xff]  }
 0x267   : > { %3489 = vmatprep.mubr.msk.bf16.mxu1 %vm4289_vm0, %v4288_v0  ;;  %3509 = vmatprep.mubr.msk.bf16.mxu0 %vm4289_vm0, %v4288_v0 }
 0x268   : > { %3474 = vmatpush3.bf16.msra.mxu1 %v3911_v40  ;;  %3494 = vmatpush3.bf16.msra.mxu0 %v3919_v48 }
 0x269   : > { %3475 = vmatprep.subr.bf16.mxu1 %v4288_v0  ;;  %3495 = vmatprep.subr.bf16.mxu0 %v4288_v0 }
 0x26c   : > { %3476 = vmatpush3.bf16.msra.mxu1 %v3912_v41  ;;  %3496 = vmatpush3.bf16.msra.mxu0 %v3921_v13 }
 0x26d   : > { %3477 = vmatprep.subr.bf16.mxu1 %v4288_v0  ;;  %3497 = vmatprep.subr.bf16.mxu0 %v4288_v0 }
 0x270   : > { %3478 = vmatpush3.bf16.msra.mxu1 %v3913_v42  ;;  %3498 = vmatpush3.bf16.msra.mxu0 %v3923_v15  ;;  %v3146_v42 = vunpack.c.l.bf16 %v3198_v39 }
 0x271   : > { %3479 = vmatprep.subr.bf16.mxu1 %v4288_v0  ;;  %3499 = vmatprep.subr.bf16.mxu0 %v4288_v0 }
 0x274   : > { %3480 = vmatpush3.bf16.msra.mxu1 %v3914_v43  ;;  %3500 = vmatpush3.bf16.msra.mxu0 %v3925_v17 }
 0x275   : > { %3481 = vmatprep.subr.bf16.mxu1 %v4288_v0  ;;  %3501 = vmatprep.subr.bf16.mxu0 %v4288_v0 }
 0x278   : > { %3482 = vmatpush3.bf16.msra.mxu1 %v3915_v44  ;;  %3502 = vmatpush3.bf16.msra.mxu0 %v3927_v19 }
 0x279   : > { %3483 = vmatprep.subr.bf16.mxu1 %v4288_v0  ;;  %3503 = vmatprep.subr.bf16.mxu0 %v4288_v0 }
 0x27c   : > { %3484 = vmatpush3.bf16.msra.mxu1 %v3916_v45  ;;  %3504 = vmatpush3.bf16.msra.mxu0 %v3929_v21 }
 0x27d   : > { %3485 = vmatprep.subr.bf16.mxu1 %v4288_v0  ;;  %3505 = vmatprep.subr.bf16.mxu0 %v4288_v0 }
 0x280   : > { %3486 = vmatpush3.bf16.msra.mxu1 %v3917_v46  ;;  %3506 = vmatpush3.bf16.msra.mxu0 %v3931_v23  ;;  %v3147_v46 = vunpack.c.h.bf16 %v3198_v39  ;;  %v3947_v39 = vld [vmem:[#allocation8 + $0x28] sm:$0xff]  }
 0x281   : > { %3487 = vmatprep.subr.bf16.mxu1 %v4288_v0  ;;  %3507 = vmatprep.subr.bf16.mxu0 %v4288_v0 }
 0x284   : > { %3488 = vmatpush3.bf16.msra.mxu1 %v3918_v47  ;;  %3508 = vmatpush3.bf16.msra.mxu0 %v3933_v25 }
 0x285   : > { %3513 = vmatprep.subr.bf16.mxu1 %v4288_v0  ;;  %3533 = vmatprep.subr.bf16.mxu0 %v4288_v0 }
 0x326   : > { %v942_v51 = vpop.f32.mrf.mxu1  ;;  %v4616_v52 = vpop.f32.mrf.mxu0 }
 0x327   : > { %v1059_v53 = vadd.f32 %v3138_v50, %v942_v51  ;;  %v1186_v30 = vadd.f32 %v3142_v28, %v4616_v52 }
 0x328   : > { %v3451_v55 = vpop.f32.mrf.mxu1  ;;  %v3471_v56 = vpop.f32.mrf.mxu0 }
 0x329   : > { %v1061_v57 = vsub.f32 0.0, %v1059_v53  ;;  %v1188_v32 = vsub.f32 0.0, %v1186_v30 }
 0x32a   : > { %v945_v58 = vpop.f32.mrf.mxu1  ;;  %v4618_v59 = vpop.f32.mrf.mxu0 }
 0x32b   : > { %v1063_v60 = vmul.f32 1.442695, %v1061_v57  ;;  %v1060_v61 = vadd.f32 %v3139_v54, %v945_v58  ;;  %v1187_v31 = vadd.f32 %v3143_v29, %v4618_v59  ;;  %v1190_v35 = vmul.f32 1.442695, %v1188_v32 }
 0x32c   : > { %v3452_v62 = vpop.f32.mrf.mxu1  ;;  %v3472_v63 = vpop.f32.mrf.mxu0 }
 0x32d   : > { %4035 = vpow2.f32 %v1063_v60  ;;  %v1062_v1 = vsub.f32 0.0, %v1060_v61  ;;  %v1189_v33 = vsub.f32 0.0, %v1187_v31 }
 0x32f   : > { %v1065_v2 = vmul.f32 1.442695, %v1062_v1  ;;  %v1192_v36 = vmul.f32 1.442695, %v1189_v33  ;;  %v3937_v1 = vld [vmem:[#allocation11 + $0x28] sm:$0xff]   ;;  %v3944_v33 = vld [vmem:[#allocation10 + $0x38] sm:$0xff]  }
 0x331   : > { %4037 = vpow2.f32 %v1065_v2  ;;  %v3938_v2 = vld [vmem:[#allocation11 + $0x20] sm:$0xff]  }
 0x33a   : > { %v4036_v3 = vpop.eup %4035 }
 0x33b   : > { %v1067_v4 = vadd.f32 1.0, %v4036_v3  ;;  %v3939_v3 = vld [vmem:[#allocation11 + $0x18] sm:$0xff]  }
 0x33d   : > { %4039 = vrcp.f32 %v1067_v4  ;;  %v3940_v4 = vld [vmem:[#allocation11 + $0x10] sm:$0xff]  }
 0x33e   : > { %v4038_v5 = vpop.eup %4037 }
 0x33f   : > { %v1068_v6 = vadd.f32 1.0, %v4038_v5  ;;  %v3941_v5 = vld [vmem:[#allocation11 + $0x8] sm:$0xff]  }
 0x341   : > { %4041 = vrcp.f32 %v1068_v6  ;;  %v3942_v6 = vld [vmem:[#allocation11] sm:$0xff]  }
 0x342   : > { %4043 = vpow2.f32 %v1190_v35 }
 0x343   : > { %4045 = vpow2.f32 %v1192_v36  ;;  %v3945_v36 = vld [vmem:[#allocation8 + $0x30] sm:$0xff]  }
 0x34a   : > { %v4040_v7 = vpop.eup %4039 }
 0x34b   : > { %v1073_v9 = vmul.f32 %v4040_v7, %v4590_v34  ;;  %v3943_v7 = vld [vmem:[#allocation8 + $0x38] sm:$0xff]  }
 0x34e   : > { %v4042_v8 = vpop.eup %4041 }
 0x34f   : > { %v1074_v10 = vmul.f32 %v4042_v8, %v4596_v38  ;;  %v4044_v37 = vpop.eup %4043  ;;  %v3199_v8 = vld [vmem:[%s4511_s12 + $0x10] sm:$0xff]  }
 0x350   : > { %v4046_v40 = vpop.eup %4045  ;;  %v1194_v41 = vadd.f32 1.0, %v4044_v37  ;;  %v3151_v13 = vunpack.c.h.bf16 %v3199_v8  ;;  %v3946_v37 = vld [vmem:[#allocation10 + $0x30] sm:$0xff]  }
 0x351   : > { %v1075_v12 = vpack.c.bf16 %v1074_v10, %v1073_v9  ;;  %v1195_v43 = vadd.f32 1.0, %v4046_v40  ;;  %v3150_v9 = vunpack.c.l.bf16 %v3199_v8  ;;  %v3948_v40 = vld [vmem:[#allocation10 + $0x28] sm:$0xff]  }
 0x352   : > { %4047 = vrcp.f32 %v1194_v41  ;;  %v3949_v41 = vld [vmem:[#allocation8 + $0x20] sm:$0xff]  }
 0x353   : > { %3490 = vmatmul.mubr.bf16.vlgmr.msra.gmra.mxu1 %v1075_v12  ;;  %4049 = vrcp.f32 %v1195_v43  ;;  %v3951_v43 = vld [vmem:[#allocation8 + $0x18] sm:$0xff]  }
 0x354   : > { %3514 = vmatpush3.bf16.msra.mxu1 %v3920_v11  ;;  %3529 = vmatprep.mubr.msk.bf16.mxu1 %vm4289_vm0, %v4288_v0 }
 0x355   : > { %3515 = vmatprep.subr.bf16.mxu1 %v4288_v0 }
 0x358   : > { %3516 = vmatpush3.bf16.msra.mxu1 %v3922_v14 }
 0x359   : > { %3517 = vmatprep.subr.bf16.mxu1 %v4288_v0 }
 0x35c   : > { %3518 = vmatpush3.bf16.msra.mxu1 %v3924_v16 }
 0x35d   : > { %3519 = vmatprep.subr.bf16.mxu1 %v4288_v0 }
 0x35f   : > { %v4048_v51 = vpop.eup %4047 }
 0x360   : > { %3520 = vmatpush3.bf16.msra.mxu1 %v3926_v18  ;;  %v4050_v52 = vpop.eup %4049  ;;  %v1211_v53 = vsub.f32 1.0, %v4048_v51  ;;  %v1209_v56 = vmul.f32 %v4048_v51, %v4590_v34  ;;  %v3935_v34 = vld [vmem:[#allocation11 + $0x38] sm:$0xff]   ;;  %v3200_v51 = vld [vmem:[%s4518_s13 + $0x10] sm:$0xff]  }
 0x361   : > { %3521 = vmatprep.subr.bf16.mxu1 %v4288_v0  ;;  %v1212_v57 = vsub.f32 1.0, %v4050_v52  ;;  %v1210_v61 = vmul.f32 %v4050_v52, %v4596_v38  ;;  %v3936_v38 = vld [vmem:[#allocation11 + $0x30] sm:$0xff]   ;;  %v3154_v52 = vunpack.c.l.bf16 %v3200_v51 }
 0x364   : > { %3522 = vmatpush3.bf16.msra.mxu1 %v3928_v20 }
 0x365   : > { %3523 = vmatprep.subr.bf16.mxu1 %v4288_v0 }
 0x368   : > { %3524 = vmatpush3.bf16.msra.mxu1 %v3930_v22 }
 0x369   : > { %3525 = vmatprep.subr.bf16.mxu1 %v4288_v0 }
 0x36c   : > { %3526 = vmatpush3.bf16.msra.mxu1 %v3932_v24 }
 0x36d   : > { %3527 = vmatprep.subr.bf16.mxu1 %v4288_v0 }
 0x370   : > { %3528 = vmatpush3.bf16.msra.mxu1 %v3934_v26 }
 0x371   : > { %3553 = vmatprep.subr.bf16.mxu1 %v4288_v0 }
 0x413   : > { %v1174_v44 = vpop.f32.mrf.mxu1 }
 0x414   : > { %v1205_v45 = vadd.f32 %v3146_v42, %v1174_v44  ;;  %v3950_v42 = vld [vmem:[#allocation10 + $0x20] sm:$0xff]   ;;  %v3952_v44 = vld [vmem:[#allocation10 + $0x18] sm:$0xff]  }
 0x415   : > { %v3491_v47 = vpop.f32.mrf.mxu1 }
 0x416   : > { %4051 = vtanh.f32 %v1205_v45  ;;  %v3953_v45 = vld [vmem:[#allocation8 + $0x10] sm:$0xff]   ;;  %v3955_v47 = vld [vmem:[#allocation8 + $0x8] sm:$0xff]  }
 0x417   : > { %v1177_v48 = vpop.f32.mrf.mxu1 }
 0x418   : > { %v1206_v49 = vadd.f32 %v3147_v46, %v1177_v48  ;;  %v3954_v46 = vld [vmem:[#allocation10 + $0x10] sm:$0xff]   ;;  %v3956_v48 = vld [vmem:[#allocation10 + $0x8] sm:$0xff]  }
 0x419   : > { %v3492_v50 = vpop.f32.mrf.mxu1 }
 0x41a   : > { %4053 = vtanh.f32 %v1206_v49  ;;  %v3957_v49 = vld [vmem:[#allocation8] sm:$0xff]  }
 0x41b   : > { %v3958_v50 = vld [vmem:[#allocation10] sm:$0xff]  }
 0x423   : > { %v4052_v54 = vpop.eup %4051 }
 0x424   : > { %v1213_v55 = vmul.f32 %v4052_v54, %v1211_v53  ;;  %v3155_v53 = vunpack.c.h.bf16 %v3200_v51 }
 0x426   : > { %v4644_v58 = vadd.f32 %v1213_v55, %v1209_v56 }
 0x427   : > { %v4054_v59 = vpop.eup %4053 }
 0x428   : > { %v1214_v60 = vmul.f32 %v4054_v59, %v1212_v57  ;;  %2986 = vst [vmem:[%s4592_s3 + $0x10] sm:$0xff] %v4644_v58 }
 0x42a   : > { %v4649_v62 = vadd.f32 %v1214_v60, %v1210_v61 }
 0x42c   : > { %2987 = vst [vmem:[%s4592_s3 + $0x18] sm:$0xff] %v4649_v62  ;;  %v1220_v63 = vpack.c.bf16 %v4649_v62, %v4644_v58 }
 0x42e   : > { %3510 = vmatmul.mubr.bf16.vlgmr.msra.gmra.mxu0 %v1220_v63  ;;  %3530 = vmatmul.mubr.bf16.vlgmr.msra.gmra.mxu1 %v1220_v63  ;;  %v3201_v63 = vld [vmem:[%s4524_s0 + $0x10] sm:$0xff]  }
 0x42f   : > { %3549 = vmatprep.mubr.msk.bf16.mxu0 %vm4289_vm0, %v4288_v0  ;;  %3569 = vmatprep.mubr.msk.bf16.mxu1 %vm4289_vm0, %v4288_v0 }
 0x430   : > { %3534 = vmatpush3.bf16.msra.mxu0 %v3935_v34  ;;  %3554 = vmatpush3.bf16.msra.mxu1 %v3943_v7 }
 0x431   : > { %3535 = vmatprep.subr.bf16.mxu0 %v4288_v0  ;;  %3555 = vmatprep.subr.bf16.mxu1 %v4288_v0 }
 0x434   : > { %3536 = vmatpush3.bf16.msra.mxu0 %v3936_v38  ;;  %3556 = vmatpush3.bf16.msra.mxu1 %v3945_v36 }
 0x435   : > { %3537 = vmatprep.subr.bf16.mxu0 %v4288_v0  ;;  %3557 = vmatprep.subr.bf16.mxu1 %v4288_v0 }
 0x438   : > { %3538 = vmatpush3.bf16.msra.mxu0 %v3937_v1  ;;  %3558 = vmatpush3.bf16.msra.mxu1 %v3947_v39  ;;  %v3158_v1 = vunpack.c.l.bf16 %v3201_v63 }
 0x439   : > { %3539 = vmatprep.subr.bf16.mxu0 %v4288_v0  ;;  %3559 = vmatprep.subr.bf16.mxu1 %v4288_v0 }
 0x43c   : > { %3540 = vmatpush3.bf16.msra.mxu0 %v3938_v2  ;;  %3560 = vmatpush3.bf16.msra.mxu1 %v3949_v41 }
 0x43d   : > { %3541 = vmatprep.subr.bf16.mxu0 %v4288_v0  ;;  %3561 = vmatprep.subr.bf16.mxu1 %v4288_v0 }
 0x440   : > { %3542 = vmatpush3.bf16.msra.mxu0 %v3939_v3  ;;  %3562 = vmatpush3.bf16.msra.mxu1 %v3951_v43 }
 0x441   : > { %3543 = vmatprep.subr.bf16.mxu0 %v4288_v0  ;;  %3563 = vmatprep.subr.bf16.mxu1 %v4288_v0 }
 0x444   : > { %3544 = vmatpush3.bf16.msra.mxu0 %v3940_v4  ;;  %3564 = vmatpush3.bf16.msra.mxu1 %v3953_v45 }
 0x445   : > { %3545 = vmatprep.subr.bf16.mxu0 %v4288_v0  ;;  %3565 = vmatprep.subr.bf16.mxu1 %v4288_v0 }
 0x448   : > { %3546 = vmatpush3.bf16.msra.mxu0 %v3941_v5  ;;  %3566 = vmatpush3.bf16.msra.mxu1 %v3955_v47  ;;  %v3159_v5 = vunpack.c.h.bf16 %v3201_v63  ;;  %v3971_v63 = vld [vmem:[#allocation8 + $0x28] sm:$0xff]  }
 0x449   : > { %3547 = vmatprep.subr.bf16.mxu0 %v4288_v0  ;;  %3567 = vmatprep.subr.bf16.mxu1 %v4288_v0 }
 0x44c   : > { %3548 = vmatpush3.bf16.msra.mxu0 %v3942_v6  ;;  %3568 = vmatpush3.bf16.msra.mxu1 %v3957_v49 }
 0x44d   : > { %3573 = vmatprep.subr.bf16.mxu0 %v4288_v0  ;;  %3593 = vmatprep.subr.bf16.mxu1 %v4288_v0 }
 0x4ee   : > { %v1319_v10 = vpop.f32.mrf.mxu0  ;;  %v4669_v11 = vpop.f32.mrf.mxu1 }
 0x4ef   : > { %v1436_v12 = vadd.f32 %v3150_v9, %v1319_v10  ;;  %v1563_v54 = vadd.f32 %v3154_v52, %v4669_v11 }
 0x4f0   : > { %v3511_v14 = vpop.f32.mrf.mxu0  ;;  %v3531_v15 = vpop.f32.mrf.mxu1 }
 0x4f1   : > { %v1438_v16 = vsub.f32 0.0, %v1436_v12  ;;  %v1565_v56 = vsub.f32 0.0, %v1563_v54 }
 0x4f2   : > { %v1322_v17 = vpop.f32.mrf.mxu0  ;;  %v4671_v18 = vpop.f32.mrf.mxu1 }
 0x4f3   : > { %v1440_v19 = vmul.f32 1.442695, %v1438_v16  ;;  %v1437_v20 = vadd.f32 %v3151_v13, %v1322_v17  ;;  %v1564_v55 = vadd.f32 %v3155_v53, %v4671_v18  ;;  %v1567_v59 = vmul.f32 1.442695, %v1565_v56 }
 0x4f4   : > { %v3512_v21 = vpop.f32.mrf.mxu0  ;;  %v3532_v22 = vpop.f32.mrf.mxu1 }
 0x4f5   : > { %4055 = vpow2.f32 %v1440_v19  ;;  %v1439_v23 = vsub.f32 0.0, %v1437_v20  ;;  %v1566_v57 = vsub.f32 0.0, %v1564_v55 }
 0x4f7   : > { %v1442_v24 = vmul.f32 1.442695, %v1439_v23  ;;  %v1569_v60 = vmul.f32 1.442695, %v1566_v57  ;;  %v3961_v23 = vld [vmem:[#allocation11 + $0x28] sm:$0xff]   ;;  %v3968_v57 = vld [vmem:[#allocation10 + $0x38] sm:$0xff]  }
 0x4f9   : > { %4057 = vpow2.f32 %v1442_v24  ;;  %v3962_v24 = vld [vmem:[#allocation11 + $0x20] sm:$0xff]  }
 0x502   : > { %v4056_v25 = vpop.eup %4055 }
 0x503   : > { %v1444_v26 = vadd.f32 1.0, %v4056_v25  ;;  %v3963_v25 = vld [vmem:[#allocation11 + $0x18] sm:$0xff]  }
 0x505   : > { %4059 = vrcp.f32 %v1444_v26  ;;  %v3964_v26 = vld [vmem:[#allocation11 + $0x10] sm:$0xff]  }
 0x506   : > { %v4058_v27 = vpop.eup %4057 }
 0x507   : > { %v1445_v28 = vadd.f32 1.0, %v4058_v27  ;;  %v3965_v27 = vld [vmem:[#allocation11 + $0x8] sm:$0xff]  }
 0x509   : > { %4061 = vrcp.f32 %v1445_v28  ;;  %v3966_v28 = vld [vmem:[#allocation11] sm:$0xff]  }
 0x50a   : > { %4063 = vpow2.f32 %v1567_v59 }
 0x50b   : > { %4065 = vpow2.f32 %v1569_v60  ;;  %v3969_v60 = vld [vmem:[#allocation8 + $0x30] sm:$0xff]  }
 0x512   : > { %v4060_v29 = vpop.eup %4059 }
 0x513   : > { %v1450_v31 = vmul.f32 %v4060_v29, %v4644_v58  ;;  %v3967_v29 = vld [vmem:[#allocation8 + $0x38] sm:$0xff]  }
 0x516   : > { %v4062_v30 = vpop.eup %4061 }
 0x517   : > { %v1451_v32 = vmul.f32 %v4062_v30, %v4649_v62  ;;  %v4064_v61 = vpop.eup %4063  ;;  %v3202_v30 = vld [vmem:[%s4511_s12 + $0x18] sm:$0xff]  }
 0x518   : > { %v4066_v34 = vpop.eup %4065  ;;  %v1571_v38 = vadd.f32 1.0, %v4064_v61  ;;  %v3163_v36 = vunpack.c.h.bf16 %v3202_v30  ;;  %v3970_v61 = vld [vmem:[#allocation10 + $0x30] sm:$0xff]  }
 0x519   : > { %v1452_v35 = vpack.c.bf16 %v1451_v32, %v1450_v31  ;;  %v1572_v2 = vadd.f32 1.0, %v4066_v34  ;;  %v3162_v31 = vunpack.c.l.bf16 %v3202_v30  ;;  %v3972_v34 = vld [vmem:[#allocation10 + $0x28] sm:$0xff]  }
 0x51a   : > { %4067 = vrcp.f32 %v1571_v38  ;;  %v3973_v38 = vld [vmem:[#allocation8 + $0x20] sm:$0xff]  }
 0x51b   : > { %3550 = vmatmul.mubr.bf16.vlgmr.msra.gmra.mxu0 %v1452_v35  ;;  %4069 = vrcp.f32 %v1572_v2  ;;  %v3975_v2 = vld [vmem:[#allocation8 + $0x18] sm:$0xff]  }
 0x51c   : > { %3574 = vmatpush3.bf16.msra.mxu0 %v3944_v33  ;;  %3589 = vmatprep.mubr.msk.bf16.mxu0 %vm4289_vm0, %v4288_v0 }
 0x51d   : > { %3575 = vmatprep.subr.bf16.mxu0 %v4288_v0 }
 0x520   : > { %3576 = vmatpush3.bf16.msra.mxu0 %v3946_v37 }
 0x521   : > { %3577 = vmatprep.subr.bf16.mxu0 %v4288_v0 }
 0x524   : > { %3578 = vmatpush3.bf16.msra.mxu0 %v3948_v40 }
 0x525   : > { %3579 = vmatprep.subr.bf16.mxu0 %v4288_v0 }
 0x527   : > { %v4068_v10 = vpop.eup %4067 }
 0x528   : > { %3580 = vmatpush3.bf16.msra.mxu0 %v3950_v42  ;;  %v4070_v11 = vpop.eup %4069  ;;  %v1588_v12 = vsub.f32 1.0, %v4068_v10  ;;  %v1586_v15 = vmul.f32 %v4068_v10, %v4644_v58  ;;  %v3959_v58 = vld [vmem:[#allocation11 + $0x38] sm:$0xff]  }
 0x529   : > { %3581 = vmatprep.subr.bf16.mxu0 %v4288_v0  ;;  %v1589_v16 = vsub.f32 1.0, %v4070_v11  ;;  %v1587_v20 = vmul.f32 %v4070_v11, %v4649_v62  ;;  %v3960_v62 = vld [vmem:[#allocation11 + $0x30] sm:$0xff]   ;;  %v3203_v10 = vld [vmem:[%s4518_s13 + $0x18] sm:$0xff]  }
 0x52a   : > { %v3166_v11 = vunpack.c.l.bf16 %v3203_v10 }
 0x52c   : > { %3582 = vmatpush3.bf16.msra.mxu0 %v3952_v44 }
 0x52d   : > { %3583 = vmatprep.subr.bf16.mxu0 %v4288_v0 }
 0x530   : > { %3584 = vmatpush3.bf16.msra.mxu0 %v3954_v46 }
 0x531   : > { %3585 = vmatprep.subr.bf16.mxu0 %v4288_v0 }
 0x534   : > { %3586 = vmatpush3.bf16.msra.mxu0 %v3956_v48 }
 0x535   : > { %3587 = vmatprep.subr.bf16.mxu0 %v4288_v0 }
 0x538   : > { %3588 = vmatpush3.bf16.msra.mxu0 %v3958_v50 }
 0x539   : > { %3613 = vmatprep.subr.bf16.mxu0 %v4288_v0 }
 0x5db   : > { %v1551_v3 = vpop.f32.mrf.mxu0 }
 0x5dc   : > { %v1582_v4 = vadd.f32 %v3158_v1, %v1551_v3  ;;  %v3974_v1 = vld [vmem:[#allocation10 + $0x20] sm:$0xff]   ;;  %v3976_v3 = vld [vmem:[#allocation10 + $0x18] sm:$0xff]  }
 0x5dd   : > { %v3551_v6 = vpop.f32.mrf.mxu0 }
 0x5de   : > { %4071 = vtanh.f32 %v1582_v4  ;;  %v3977_v4 = vld [vmem:[#allocation8 + $0x10] sm:$0xff]   ;;  %v3979_v6 = vld [vmem:[#allocation8 + $0x8] sm:$0xff]  }
 0x5df   : > { %v1554_v7 = vpop.f32.mrf.mxu0 }
 0x5e0   : > { %v1583_v8 = vadd.f32 %v3159_v5, %v1554_v7  ;;  %v3978_v5 = vld [vmem:[#allocation10 + $0x10] sm:$0xff]   ;;  %v3980_v7 = vld [vmem:[#allocation10 + $0x8] sm:$0xff]  }
 0x5e1   : > { %v3552_v9 = vpop.f32.mrf.mxu0 }
 0x5e2   : > { %4073 = vtanh.f32 %v1583_v8  ;;  %v3981_v8 = vld [vmem:[#allocation8] sm:$0xff]  }
 0x5e3   : > { %v3982_v9 = vld [vmem:[#allocation10] sm:$0xff]  }
 0x5eb   : > { %v4072_v13 = vpop.eup %4071 }
 0x5ec   : > { %v1590_v14 = vmul.f32 %v4072_v13, %v1588_v12  ;;  %v3167_v12 = vunpack.c.h.bf16 %v3203_v10 }
 0x5ee   : > { %v4697_v17 = vadd.f32 %v1590_v14, %v1586_v15 }
 0x5ef   : > { %v4074_v18 = vpop.eup %4073 }
 0x5f0   : > { %v1591_v19 = vmul.f32 %v4074_v18, %v1589_v16  ;;  %3018 = vst [vmem:[%s4592_s3 + $0x20] sm:$0xff] %v4697_v17 }
 0x5f2   : > { %v4702_v21 = vadd.f32 %v1591_v19, %v1587_v20 }
 0x5f4   : > { %3019 = vst [vmem:[%s4592_s3 + $0x28] sm:$0xff] %v4702_v21  ;;  %v1597_v22 = vpack.c.bf16 %v4702_v21, %v4697_v17 }
 0x5f6   : > { %3570 = vmatmul.mubr.bf16.vlgmr.msra.gmra.mxu1 %v1597_v22  ;;  %3590 = vmatmul.mubr.bf16.vlgmr.msra.gmra.mxu0 %v1597_v22  ;;  %v3204_v22 = vld [vmem:[%s4524_s0 + $0x18] sm:$0xff]  }
 0x5f7   : > { %3609 = vmatprep.mubr.msk.bf16.mxu1 %vm4289_vm0, %v4288_v0  ;;  %3629 = vmatprep.mubr.msk.bf16.mxu0 %vm4289_vm0, %v4288_v0 }
 0x5f8   : > { %3594 = vmatpush3.bf16.msra.mxu1 %v3959_v58  ;;  %3614 = vmatpush3.bf16.msra.mxu0 %v3967_v29 }
 0x5f9   : > { %3595 = vmatprep.subr.bf16.mxu1 %v4288_v0  ;;  %3615 = vmatprep.subr.bf16.mxu0 %v4288_v0 }
 0x5fc   : > { %3596 = vmatpush3.bf16.msra.mxu1 %v3960_v62  ;;  %3616 = vmatpush3.bf16.msra.mxu0 %v3969_v60 }
 0x5fd   : > { %3597 = vmatprep.subr.bf16.mxu1 %v4288_v0  ;;  %3617 = vmatprep.subr.bf16.mxu0 %v4288_v0 }
 0x600   : > { %3598 = vmatpush3.bf16.msra.mxu1 %v3961_v23  ;;  %3618 = vmatpush3.bf16.msra.mxu0 %v3971_v63  ;;  %v3170_v23 = vunpack.c.l.bf16 %v3204_v22 }
 0x601   : > { %3599 = vmatprep.subr.bf16.mxu1 %v4288_v0  ;;  %3619 = vmatprep.subr.bf16.mxu0 %v4288_v0 }
 0x604   : > { %3600 = vmatpush3.bf16.msra.mxu1 %v3962_v24  ;;  %3620 = vmatpush3.bf16.msra.mxu0 %v3973_v38 }
 0x605   : > { %3601 = vmatprep.subr.bf16.mxu1 %v4288_v0  ;;  %3621 = vmatprep.subr.bf16.mxu0 %v4288_v0 }
 0x608   : > { %3602 = vmatpush3.bf16.msra.mxu1 %v3963_v25  ;;  %3622 = vmatpush3.bf16.msra.mxu0 %v3975_v2 }
 0x609   : > { %3603 = vmatprep.subr.bf16.mxu1 %v4288_v0  ;;  %3623 = vmatprep.subr.bf16.mxu0 %v4288_v0 }
 0x60c   : > { %3604 = vmatpush3.bf16.msra.mxu1 %v3964_v26  ;;  %3624 = vmatpush3.bf16.msra.mxu0 %v3977_v4 }
 0x60d   : > { %3605 = vmatprep.subr.bf16.mxu1 %v4288_v0  ;;  %3625 = vmatprep.subr.bf16.mxu0 %v4288_v0 }
 0x610   : > { %3606 = vmatpush3.bf16.msra.mxu1 %v3965_v27  ;;  %3626 = vmatpush3.bf16.msra.mxu0 %v3979_v6  ;;  %v3171_v27 = vunpack.c.h.bf16 %v3204_v22  ;;  %v3995_v22 = vld [vmem:[#allocation8 + $0x28] sm:$0xff]  }
 0x611   : > { %3607 = vmatprep.subr.bf16.mxu1 %v4288_v0  ;;  %3627 = vmatprep.subr.bf16.mxu0 %v4288_v0 }
 0x614   : > { %3608 = vmatpush3.bf16.msra.mxu1 %v3966_v28  ;;  %3628 = vmatpush3.bf16.msra.mxu0 %v3981_v8 }
 0x615   : > { %3633 = vmatprep.subr.bf16.mxu1 %v4288_v0  ;;  %3653 = vmatprep.subr.bf16.mxu0 %v4288_v0 }
 0x6b6   : > { %v1696_v32 = vpop.f32.mrf.mxu1  ;;  %v4722_v33 = vpop.f32.mrf.mxu0 }
 0x6b7   : > { %v1813_v35 = vadd.f32 %v3162_v31, %v1696_v32  ;;  %v1940_v13 = vadd.f32 %v3166_v11, %v4722_v33 }
 0x6b8   : > { %v3571_v37 = vpop.f32.mrf.mxu1  ;;  %v3591_v39 = vpop.f32.mrf.mxu0 }
 0x6b9   : > { %v1815_v40 = vsub.f32 0.0, %v1813_v35  ;;  %v1942_v15 = vsub.f32 0.0, %v1940_v13 }
 0x6ba   : > { %v1699_v41 = vpop.f32.mrf.mxu1  ;;  %v4724_v42 = vpop.f32.mrf.mxu0 }
 0x6bb   : > { %v1817_v43 = vmul.f32 1.442695, %v1815_v40  ;;  %v1814_v44 = vadd.f32 %v3163_v36, %v1699_v41  ;;  %v1941_v14 = vadd.f32 %v3167_v12, %v4724_v42  ;;  %v1944_v18 = vmul.f32 1.442695, %v1942_v15 }
 0x6bc   : > { %v3572_v45 = vpop.f32.mrf.mxu1  ;;  %v3592_v46 = vpop.f32.mrf.mxu0 }
 0x6bd   : > { %4075 = vpow2.f32 %v1817_v43  ;;  %v1816_v47 = vsub.f32 0.0, %v1814_v44  ;;  %v1943_v16 = vsub.f32 0.0, %v1941_v14 }
 0x6bf   : > { %v1819_v48 = vmul.f32 1.442695, %v1816_v47  ;;  %v1946_v19 = vmul.f32 1.442695, %v1943_v16  ;;  %v3985_v47 = vld [vmem:[#allocation11 + $0x28] sm:$0xff]   ;;  %v3992_v16 = vld [vmem:[#allocation10 + $0x38] sm:$0xff]  }
 0x6c1   : > { %4077 = vpow2.f32 %v1819_v48  ;;  %v3986_v48 = vld [vmem:[#allocation11 + $0x20] sm:$0xff]  }
 0x6ca   : > { %v4076_v49 = vpop.eup %4075 }
 0x6cb   : > { %v1821_v50 = vadd.f32 1.0, %v4076_v49  ;;  %v3987_v49 = vld [vmem:[#allocation11 + $0x18] sm:$0xff]  }
 0x6cd   : > { %4079 = vrcp.f32 %v1821_v50  ;;  %v3988_v50 = vld [vmem:[#allocation11 + $0x10] sm:$0xff]  }
 0x6ce   : > { %v4078_v51 = vpop.eup %4077 }
 0x6cf   : > { %v1822_v52 = vadd.f32 1.0, %v4078_v51  ;;  %v3989_v51 = vld [vmem:[#allocation11 + $0x8] sm:$0xff]  }
 0x6d1   : > { %4081 = vrcp.f32 %v1822_v52  ;;  %v3990_v52 = vld [vmem:[#allocation11] sm:$0xff]  }
 0x6d2   : > { %4083 = vpow2.f32 %v1944_v18 }
 0x6d3   : > { %4085 = vpow2.f32 %v1946_v19  ;;  %v3993_v19 = vld [vmem:[#allocation8 + $0x30] sm:$0xff]  }
 0x6da   : > { %v4080_v53 = vpop.eup %4079 }
 0x6db   : > { %v1827_v55 = vmul.f32 %v4080_v53, %v4697_v17  ;;  %v3991_v53 = vld [vmem:[#allocation8 + $0x38] sm:$0xff]  }
 0x6de   : > { %v4082_v54 = vpop.eup %4081 }
 0x6df   : > { %v1828_v56 = vmul.f32 %v4082_v54, %v4702_v21  ;;  %v4084_v20 = vpop.eup %4083  ;;  %v3205_v54 = vld [vmem:[%s4511_s12 + $0x20] sm:$0xff]  }
 0x6e0   : > { %v4086_v58 = vpop.eup %4085  ;;  %v1948_v62 = vadd.f32 1.0, %v4084_v20  ;;  %v3175_v60 = vunpack.c.h.bf16 %v3205_v54  ;;  %v3994_v20 = vld [vmem:[#allocation10 + $0x30] sm:$0xff]  }
 0x6e1   : > { %v1829_v59 = vpack.c.bf16 %v1828_v56, %v1827_v55  ;;  %v1949_v24 = vadd.f32 1.0, %v4086_v58  ;;  %v3174_v55 = vunpack.c.l.bf16 %v3205_v54  ;;  %v3996_v58 = vld [vmem:[#allocation10 + $0x28] sm:$0xff]  }
 0x6e2   : > { %4087 = vrcp.f32 %v1948_v62  ;;  %v3997_v62 = vld [vmem:[#allocation8 + $0x20] sm:$0xff]  }
 0x6e3   : > { %3610 = vmatmul.mubr.bf16.vlgmr.msra.gmra.mxu1 %v1829_v59  ;;  %4089 = vrcp.f32 %v1949_v24  ;;  %v3999_v24 = vld [vmem:[#allocation8 + $0x18] sm:$0xff]  }
 0x6e4   : > { %3634 = vmatpush3.bf16.msra.mxu1 %v3968_v57  ;;  %3649 = vmatprep.mubr.msk.bf16.mxu1 %vm4289_vm0, %v4288_v0 }
 0x6e5   : > { %3635 = vmatprep.subr.bf16.mxu1 %v4288_v0 }
 0x6e8   : > { %3636 = vmatpush3.bf16.msra.mxu1 %v3970_v61 }
 0x6e9   : > { %3637 = vmatprep.subr.bf16.mxu1 %v4288_v0 }
 0x6ec   : > { %3638 = vmatpush3.bf16.msra.mxu1 %v3972_v34 }
 0x6ed   : > { %3639 = vmatprep.subr.bf16.mxu1 %v4288_v0 }
 0x6ef   : > { %v4088_v32 = vpop.eup %4087 }
 0x6f0   : > { %3640 = vmatpush3.bf16.msra.mxu1 %v3974_v1  ;;  %v4090_v33 = vpop.eup %4089  ;;  %v1965_v35 = vsub.f32 1.0, %v4088_v32  ;;  %v1963_v39 = vmul.f32 %v4088_v32, %v4697_v17  ;;  %v3983_v17 = vld [vmem:[#allocation11 + $0x38] sm:$0xff]   ;;  %v3206_v32 = vld [vmem:[%s4518_s13 + $0x20] sm:$0xff]  }
 0x6f1   : > { %3641 = vmatprep.subr.bf16.mxu1 %v4288_v0  ;;  %v1966_v40 = vsub.f32 1.0, %v4090_v33  ;;  %v1964_v44 = vmul.f32 %v4090_v33, %v4702_v21  ;;  %v3984_v21 = vld [vmem:[#allocation11 + $0x30] sm:$0xff]   ;;  %v3178_v33 = vunpack.c.l.bf16 %v3206_v32 }
 0x6f4   : > { %3642 = vmatpush3.bf16.msra.mxu1 %v3976_v3 }
 0x6f5   : > { %3643 = vmatprep.subr.bf16.mxu1 %v4288_v0 }
 0x6f8   : > { %3644 = vmatpush3.bf16.msra.mxu1 %v3978_v5 }
 0x6f9   : > { %3645 = vmatprep.subr.bf16.mxu1 %v4288_v0 }
 0x6fc   : > { %3646 = vmatpush3.bf16.msra.mxu1 %v3980_v7 }
 0x6fd   : > { %3647 = vmatprep.subr.bf16.mxu1 %v4288_v0 }
 0x700   : > { %3648 = vmatpush3.bf16.msra.mxu1 %v3982_v9 }
 0x701   : > { %3673 = vmatprep.subr.bf16.mxu1 %v4288_v0 }
 0x7a3   : > { %v1928_v25 = vpop.f32.mrf.mxu1 }
 0x7a4   : > { %v1959_v26 = vadd.f32 %v3170_v23, %v1928_v25  ;;  %v3998_v23 = vld [vmem:[#allocation10 + $0x20] sm:$0xff]   ;;  %v4000_v25 = vld [vmem:[#allocation10 + $0x18] sm:$0xff]  }
 0x7a5   : > { %v3611_v28 = vpop.f32.mrf.mxu1 }
 0x7a6   : > { %4091 = vtanh.f32 %v1959_v26  ;;  %v4001_v26 = vld [vmem:[#allocation8 + $0x10] sm:$0xff]   ;;  %v4003_v28 = vld [vmem:[#allocation8 + $0x8] sm:$0xff]  }
 0x7a7   : > { %v1931_v29 = vpop.f32.mrf.mxu1 }
 0x7a8   : > { %v1960_v30 = vadd.f32 %v3171_v27, %v1931_v29  ;;  %v4002_v27 = vld [vmem:[#allocation10 + $0x10] sm:$0xff]   ;;  %v4004_v29 = vld [vmem:[#allocation10 + $0x8] sm:$0xff]  }
 0x7a9   : > { %v3612_v31 = vpop.f32.mrf.mxu1 }
 0x7aa   : > { %4093 = vtanh.f32 %v1960_v30  ;;  %v4005_v30 = vld [vmem:[#allocation8] sm:$0xff]  }
 0x7ab   : > { %v4006_v31 = vld [vmem:[#allocation10] sm:$0xff]  }
 0x7b3   : > { %v4092_v36 = vpop.eup %4091 }
 0x7b4   : > { %v1967_v37 = vmul.f32 %v4092_v36, %v1965_v35  ;;  %v3179_v35 = vunpack.c.h.bf16 %v3206_v32 }
 0x7b6   : > { %v4750_v41 = vadd.f32 %v1967_v37, %v1963_v39 }
 0x7b7   : > { %v4094_v42 = vpop.eup %4093 }
 0x7b8   : > { %v1968_v43 = vmul.f32 %v4094_v42, %v1966_v40  ;;  %3050 = vst [vmem:[%s4592_s3 + $0x30] sm:$0xff] %v4750_v41 }
 0x7ba   : > { %v4755_v45 = vadd.f32 %v1968_v43, %v1964_v44 }
 0x7bc   : > { %3051 = vst [vmem:[%s4592_s3 + $0x38] sm:$0xff] %v4755_v45  ;;  %v1974_v46 = vpack.c.bf16 %v4755_v45, %v4750_v41 }
 0x7be   : > { %3630 = vmatmul.mubr.bf16.vlgmr.msra.gmra.mxu0 %v1974_v46  ;;  %3650 = vmatmul.mubr.bf16.vlgmr.msra.gmra.mxu1 %v1974_v46  ;;  %v3207_v46 = vld [vmem:[%s4524_s0 + $0x20] sm:$0xff]  }
 0x7bf   : > { %3669 = vmatprep.mubr.msk.bf16.mxu0 %vm4289_vm0, %v4288_v0  ;;  %3689 = vmatprep.mubr.msk.bf16.mxu1 %vm4289_vm0, %v4288_v0 }
 0x7c0   : > { %3654 = vmatpush3.bf16.msra.mxu0 %v3983_v17  ;;  %3674 = vmatpush3.bf16.msra.mxu1 %v3991_v53 }
 0x7c1   : > { %3655 = vmatprep.subr.bf16.mxu0 %v4288_v0  ;;  %3675 = vmatprep.subr.bf16.mxu1 %v4288_v0 }
 0x7c4   : > { %3656 = vmatpush3.bf16.msra.mxu0 %v3984_v21  ;;  %3676 = vmatpush3.bf16.msra.mxu1 %v3993_v19 }
 0x7c5   : > { %3657 = vmatprep.subr.bf16.mxu0 %v4288_v0  ;;  %3677 = vmatprep.subr.bf16.mxu1 %v4288_v0 }
 0x7c8   : > { %3658 = vmatpush3.bf16.msra.mxu0 %v3985_v47  ;;  %3678 = vmatpush3.bf16.msra.mxu1 %v3995_v22  ;;  %v3182_v47 = vunpack.c.l.bf16 %v3207_v46 }
 0x7c9   : > { %3659 = vmatprep.subr.bf16.mxu0 %v4288_v0  ;;  %3679 = vmatprep.subr.bf16.mxu1 %v4288_v0 }
 0x7cc   : > { %3660 = vmatpush3.bf16.msra.mxu0 %v3986_v48  ;;  %3680 = vmatpush3.bf16.msra.mxu1 %v3997_v62 }
 0x7cd   : > { %3661 = vmatprep.subr.bf16.mxu0 %v4288_v0  ;;  %3681 = vmatprep.subr.bf16.mxu1 %v4288_v0 }
 0x7d0   : > { %3662 = vmatpush3.bf16.msra.mxu0 %v3987_v49  ;;  %3682 = vmatpush3.bf16.msra.mxu1 %v3999_v24 }
 0x7d1   : > { %3663 = vmatprep.subr.bf16.mxu0 %v4288_v0  ;;  %3683 = vmatprep.subr.bf16.mxu1 %v4288_v0 }
 0x7d4   : > { %3664 = vmatpush3.bf16.msra.mxu0 %v3988_v50  ;;  %3684 = vmatpush3.bf16.msra.mxu1 %v4001_v26 }
 0x7d5   : > { %3665 = vmatprep.subr.bf16.mxu0 %v4288_v0  ;;  %3685 = vmatprep.subr.bf16.mxu1 %v4288_v0 }
 0x7d8   : > { %3666 = vmatpush3.bf16.msra.mxu0 %v3989_v51  ;;  %3686 = vmatpush3.bf16.msra.mxu1 %v4003_v28  ;;  %v3183_v51 = vunpack.c.h.bf16 %v3207_v46 }
 0x7d9   : > { %3667 = vmatprep.subr.bf16.mxu0 %v4288_v0  ;;  %3687 = vmatprep.subr.bf16.mxu1 %v4288_v0 }
 0x7dc   : > { %3668 = vmatpush3.bf16.msra.mxu0 %v3990_v52  ;;  %3688 = vmatpush3.bf16.msra.mxu1 %v4005_v30 }
 0x7dd   : > { %3693 = vmatprep.subr.bf16.mxu0 %v4288_v0  ;;  %3713 = vmatprep.subr.bf16.mxu1 %v4288_v0 }
 0x87e   : > { %v2073_v56 = vpop.f32.mrf.mxu0  ;;  %v4775_v57 = vpop.f32.mrf.mxu1 }
 0x87f   : > { %v2190_v59 = vadd.f32 %v3174_v55, %v2073_v56  ;;  %v2317_v36 = vadd.f32 %v3178_v33, %v4775_v57 }
 0x880   : > { %v3631_v61 = vpop.f32.mrf.mxu0  ;;  %v3651_v63 = vpop.f32.mrf.mxu1 }
 0x881   : > { %v2192_v34 = vsub.f32 0.0, %v2190_v59  ;;  %v2319_v39 = vsub.f32 0.0, %v2317_v36 }
 0x882   : > { %v2076_v38 = vpop.f32.mrf.mxu0  ;;  %v4777_v1 = vpop.f32.mrf.mxu1 }
 0x883   : > { %v2194_v2 = vmul.f32 1.442695, %v2192_v34  ;;  %v2191_v3 = vadd.f32 %v3175_v60, %v2076_v38  ;;  %v2318_v37 = vadd.f32 %v3179_v35, %v4777_v1  ;;  %v2321_v42 = vmul.f32 1.442695, %v2319_v39  ;;  %v3209_v39 = vld [vmem:[%s4518_s13 + $0x28] sm:$0xff]  }
 0x884   : > { %v3632_v4 = vpop.f32.mrf.mxu0  ;;  %v3652_v5 = vpop.f32.mrf.mxu1 }
 0x885   : > { %4095 = vpow2.f32 %v2194_v2  ;;  %v2193_v6 = vsub.f32 0.0, %v2191_v3  ;;  %v2320_v40 = vsub.f32 0.0, %v2318_v37 }
 0x887   : > { %v2196_v7 = vmul.f32 1.442695, %v2193_v6  ;;  %v2323_v43 = vmul.f32 1.442695, %v2320_v40  ;;  %v4008_v6 = vld [vmem:[#allocation11 + $0x30] sm:$0xff]   ;;  %v3190_v40 = vunpack.c.l.bf16 %v3209_v39 }
 0x889   : > { %4097 = vpow2.f32 %v2196_v7  ;;  %v4010_v7 = vld [vmem:[#allocation11 + $0x20] sm:$0xff]  }
 0x892   : > { %v4096_v8 = vpop.eup %4095 }
 0x893   : > { %v2198_v9 = vadd.f32 1.0, %v4096_v8  ;;  %v4011_v8 = vld [vmem:[#allocation11 + $0x18] sm:$0xff]  }
 0x895   : > { %4099 = vrcp.f32 %v2198_v9  ;;  %v4012_v9 = vld [vmem:[#allocation11 + $0x10] sm:$0xff]  }
 0x896   : > { %v4098_v10 = vpop.eup %4097 }
 0x897   : > { %v2199_v11 = vadd.f32 1.0, %v4098_v10  ;;  %v4013_v10 = vld [vmem:[#allocation11 + $0x8] sm:$0xff]  }
 0x899   : > { %4101 = vrcp.f32 %v2199_v11  ;;  %v4014_v11 = vld [vmem:[#allocation11] sm:$0xff]  }
 0x89a   : > { %4103 = vpow2.f32 %v2321_v42  ;;  %v3191_v42 = vunpack.c.h.bf16 %v3209_v39 }
 0x89b   : > { %4105 = vpow2.f32 %v2323_v43 }
 0x8a2   : > { %v4100_v12 = vpop.eup %4099 }
 0x8a3   : > { %v2204_v14 = vmul.f32 %v4100_v12, %v4750_v41  ;;  %v3208_v12 = vld [vmem:[%s4511_s12 + $0x28] sm:$0xff]  }
 0x8a6   : > { %v4102_v13 = vpop.eup %4101 }
 0x8a7   : > { %v2205_v15 = vmul.f32 %v4102_v13, %v4755_v45  ;;  %v4104_v44 = vpop.eup %4103  ;;  %v3186_v13 = vunpack.c.l.bf16 %v3208_v12 }
 0x8a8   : > { %v4106_v17 = vpop.eup %4105  ;;  %v2325_v21 = vadd.f32 1.0, %v4104_v44 }
 0x8a9   : > { %v2206_v18 = vpack.c.bf16 %v2205_v15, %v2204_v14  ;;  %v2326_v48 = vadd.f32 1.0, %v4106_v17 }
 0x8aa   : > { %4107 = vrcp.f32 %v2325_v21 }
 0x8ab   : > { %3670 = vmatmul.mubr.bf16.vlgmr.msra.gmra.mxu0 %v2206_v18  ;;  %4109 = vrcp.f32 %v2326_v48  ;;  %v3187_v18 = vunpack.c.h.bf16 %v3208_v12 }
 0x8ac   : > { %3694 = vmatpush3.bf16.msra.mxu0 %v3992_v16  ;;  %3709 = vmatprep.mubr.msk.bf16.mxu0 %vm4289_vm0, %v4288_v0 }
 0x8ad   : > { %3695 = vmatprep.subr.bf16.mxu0 %v4288_v0 }
 0x8b0   : > { %3696 = vmatpush3.bf16.msra.mxu0 %v3994_v20 }
 0x8b1   : > { %3697 = vmatprep.subr.bf16.mxu0 %v4288_v0 }
 0x8b4   : > { %3698 = vmatpush3.bf16.msra.mxu0 %v3996_v58 }
 0x8b5   : > { %3699 = vmatprep.subr.bf16.mxu0 %v4288_v0 }
 0x8b7   : > { %v4108_v56 = vpop.eup %4107 }
 0x8b8   : > { %3700 = vmatpush3.bf16.msra.mxu0 %v3998_v23  ;;  %v4110_v57 = vpop.eup %4109  ;;  %v2342_v59 = vsub.f32 1.0, %v4108_v56  ;;  %v2340_v63 = vmul.f32 %v4108_v56, %v4750_v41  ;;  %v4007_v41 = vld [vmem:[#allocation11 + $0x38] sm:$0xff]  }
 0x8b9   : > { %3701 = vmatprep.subr.bf16.mxu0 %v4288_v0  ;;  %v2343_v34 = vsub.f32 1.0, %v4110_v57  ;;  %v2341_v3 = vmul.f32 %v4110_v57, %v4755_v45  ;;  %v4009_v45 = vld [vmem:[#allocation11 + $0x28] sm:$0xff]  }
 0x8bc   : > { %3702 = vmatpush3.bf16.msra.mxu0 %v4000_v25 }
 0x8bd   : > { %3703 = vmatprep.subr.bf16.mxu0 %v4288_v0 }
 0x8c0   : > { %3704 = vmatpush3.bf16.msra.mxu0 %v4002_v27 }
 0x8c1   : > { %3705 = vmatprep.subr.bf16.mxu0 %v4288_v0 }
 0x8c4   : > { %3706 = vmatpush3.bf16.msra.mxu0 %v4004_v29 }
 0x8c5   : > { %3707 = vmatprep.subr.bf16.mxu0 %v4288_v0 }
 0x8c8   : > { %3708 = vmatpush3.bf16.msra.mxu0 %v4006_v31 }
 0x96b   : > { %v2305_v49 = vpop.f32.mrf.mxu0 }
 0x96c   : > { %v2336_v50 = vadd.f32 %v3182_v47, %v2305_v49  ;;  %v3210_v49 = vld [vmem:[%s4524_s0 + $0x28] sm:$0xff]  }
 0x96d   : > { %v3671_v52 = vpop.f32.mrf.mxu0  ;;  %v3195_v56 = vunpack.c.h.bf16 %v3210_v49 }
 0x96e   : > { %4111 = vtanh.f32 %v2336_v50  ;;  %v3194_v52 = vunpack.c.l.bf16 %v3210_v49 }
 0x96f   : > { %v2308_v53 = vpop.f32.mrf.mxu0 }
 0x970   : > { %v2337_v54 = vadd.f32 %v3183_v51, %v2308_v53 }
 0x971   : > { %v3672_v55 = vpop.f32.mrf.mxu0 }
 0x972   : > { %4113 = vtanh.f32 %v2337_v54 }
 0x97b   : > { %v4112_v60 = vpop.eup %4111 }
 0x97c   : > { %v2344_v61 = vmul.f32 %v4112_v60, %v2342_v59 }
 0x97e   : > { %v4802_v38 = vadd.f32 %v2344_v61, %v2340_v63 }
 0x97f   : > { %v4114_v1 = vpop.eup %4113 }
 0x980   : > { %v2345_v2 = vmul.f32 %v4114_v1, %v2343_v34  ;;  %3082 = vst [vmem:[%s4592_s3 + $0x40] sm:$0xff] %v4802_v38 }
 0x982   : > { %v4807_v4 = vadd.f32 %v2345_v2, %v2341_v3 }
 0x984   : > { %3083 = vst [vmem:[%s4592_s3 + $0x48] sm:$0xff] %v4807_v4  ;;  %v2351_v5 = vpack.c.bf16 %v4807_v4, %v4802_v38 }
 0x986   : > { %3690 = vmatmul.mubr.bf16.vlgmr.msra.gmra.mxu1 %v2351_v5  ;;  %3710 = vmatmul.mubr.bf16.vlgmr.msra.gmra.mxu0 %v2351_v5 }
 0x987   : > { %3729 = vmatprep.mubr.msk.bf16.mxu1 %vm4289_vm0, %v4288_v0  ;;  %3714 = vmatpush3.bf16.msra.mxu1 %v4007_v41 }
 0x988   : > { %3715 = vmatprep.subr.bf16.mxu1 %v4288_v0 }
 0x98b   : > { %3716 = vmatpush3.bf16.msra.mxu1 %v4008_v6 }
 0x98c   : > { %3717 = vmatprep.subr.bf16.mxu1 %v4288_v0 }
 0x98f   : > { %3718 = vmatpush3.bf16.msra.mxu1 %v4009_v45 }
 0x990   : > { %3719 = vmatprep.subr.bf16.mxu1 %v4288_v0 }
 0x993   : > { %3720 = vmatpush3.bf16.msra.mxu1 %v4010_v7 }
 0x994   : > { %3721 = vmatprep.subr.bf16.mxu1 %v4288_v0 }
 0x997   : > { %3722 = vmatpush3.bf16.msra.mxu1 %v4011_v8 }
 0x998   : > { %3723 = vmatprep.subr.bf16.mxu1 %v4288_v0 }
 0x99b   : > { %3724 = vmatpush3.bf16.msra.mxu1 %v4012_v9 }
 0x99c   : > { %3725 = vmatprep.subr.bf16.mxu1 %v4288_v0 }
 0x99f   : > { %3726 = vmatpush3.bf16.msra.mxu1 %v4013_v10 }
 0x9a0   : > { %3727 = vmatprep.subr.bf16.mxu1 %v4288_v0 }
 0x9a3   : > { %3728 = vmatpush3.bf16.msra.mxu1 %v4014_v11 }
 0xa46   : > { %v2450_v14 = vpop.f32.mrf.mxu1  ;;  %v2555_v15 = vpop.f32.mrf.mxu0 }
 0xa47   : > { %v2567_v16 = vadd.f32 %v3186_v13, %v2450_v14  ;;  %v2694_v43 = vadd.f32 %v3190_v40, %v2555_v15 }
 0xa48   : > { %v3691_v19 = vpop.f32.mrf.mxu1  ;;  %v3711_v20 = vpop.f32.mrf.mxu0 }
 0xa49   : > { %v2569_v22 = vsub.f32 0.0, %v2567_v16  ;;  %v2696_v46 = vsub.f32 0.0, %v2694_v43 }
 0xa4a   : > { %v2453_v58 = vpop.f32.mrf.mxu1  ;;  %v2558_v62 = vpop.f32.mrf.mxu0 }
 0xa4b   : > { %v2571_v23 = vmul.f32 1.442695, %v2569_v22  ;;  %v2568_v24 = vadd.f32 %v3187_v18, %v2453_v58  ;;  %v2695_v44 = vadd.f32 %v3191_v42, %v2558_v62  ;;  %v2698_v21 = vmul.f32 1.442695, %v2696_v46 }
 0xa4c   : > { %v3692_v25 = vpop.f32.mrf.mxu1  ;;  %v3712_v26 = vpop.f32.mrf.mxu0 }
 0xa4d   : > { %4115 = vpow2.f32 %v2571_v23  ;;  %v2570_v27 = vsub.f32 0.0, %v2568_v24  ;;  %v2697_v17 = vsub.f32 0.0, %v2695_v44 }
 0xa4f   : > { %v2573_v0 = vmul.f32 1.442695, %v2570_v27  ;;  %v2700_v47 = vmul.f32 1.442695, %v2697_v17 }
 0xa51   : > { %4117 = vpow2.f32 %v2573_v0 }
 0xa5a   : > { %v4116_v28 = vpop.eup %4115 }
 0xa5b   : > { %v2575_v29 = vadd.f32 1.0, %v4116_v28 }
 0xa5d   : > { %4119 = vrcp.f32 %v2575_v29 }
 0xa5e   : > { %v4118_v30 = vpop.eup %4117 }
 0xa5f   : > { %v2576_v31 = vadd.f32 1.0, %v4118_v30 }
 0xa61   : > { %4121 = vrcp.f32 %v2576_v31 }
 0xa62   : > { %4123 = vpow2.f32 %v2698_v21 }
 0xa63   : > { %4125 = vpow2.f32 %v2700_v47 }
 0xa6a   : > { %v4120_v32 = vpop.eup %4119 }
 0xa6b   : > { %v2581_v35 = vmul.f32 %v4120_v32, %v4802_v38 }
 0xa6e   : > { %v4122_v33 = vpop.eup %4121 }
 0xa6f   : > { %v2582_v36 = vmul.f32 %v4122_v33, %v4807_v4  ;;  %v4124_v48 = vpop.eup %4123 }
 0xa70   : > { %v4126_v50 = vpop.eup %4125  ;;  %v2702_v51 = vadd.f32 1.0, %v4124_v48 }
 0xa71   : > { %v2583_v37 = vpack.c.bf16 %v2582_v36, %v2581_v35  ;;  %v2703_v53 = vadd.f32 1.0, %v4126_v50 }
 0xa72   : > { %4127 = vrcp.f32 %v2702_v51 }
 0xa73   : > { %3730 = vmatmul.mubr.bf16.vlgmr.msra.gmra.mxu1 %v2583_v37  ;;  %4129 = vrcp.f32 %v2703_v53 }
 0xa7f   : > { %v4128_v63 = vpop.eup %4127 }
 0xa80   : > { %v4130_v34 = vpop.eup %4129  ;;  %v2719_v1 = vsub.f32 1.0, %v4128_v63  ;;  %v2717_v3 = vmul.f32 %v4128_v63, %v4802_v38 }
 0xa81   : > { %v2720_v6 = vsub.f32 1.0, %v4130_v34  ;;  %v2718_v7 = vmul.f32 %v4130_v34, %v4807_v4 }
 0xb33   : > { %v2682_v54 = vpop.f32.mrf.mxu1 }
 0xb34   : > { %v2713_v55 = vadd.f32 %v3194_v52, %v2682_v54 }
 0xb35   : > { %v3731_v57 = vpop.f32.mrf.mxu1 }
 0xb36   : > { %4131 = vtanh.f32 %v2713_v55 }
 0xb37   : > { %v2685_v59 = vpop.f32.mrf.mxu1 }
 0xb38   : > { %v2714_v60 = vadd.f32 %v3195_v56, %v2685_v59 }
 0xb39   : > { %v3732_v61 = vpop.f32.mrf.mxu1 }
 0xb3a   : > { %4133 = vtanh.f32 %v2714_v60 }
 0xb43   : > { %v4132_v2 = vpop.eup %4131 }
 0xb44   : > { %v2721_v5 = vmul.f32 %v4132_v2, %v2719_v1 }
 0xb46   : > { %v2723_v41 = vadd.f32 %v2721_v5, %v2717_v3 }
 0xb47   : > { %v4134_v45 = vpop.eup %4133 }
 0xb48   : > { %3114 = vst [vmem:[%s4592_s3 + $0x50] sm:$0xff] %v2723_v41  ;;  %v2722_v8 = vmul.f32 %v4134_v45, %v2720_v6 }
 0xb4a   : > { %v2724_v9 = vadd.f32 %v2722_v8, %v2718_v7 }
 0xb4c   : > { %3115 = vst [vmem:[%s4592_s3 + $0x58] sm:$0xff] %v2724_v9 }
 0xb4d   : > { %s3123_s18 = sshll.u32 %s4354_s25, 8  ;;  %s2752_s4 = sshll.u32 %s4592_s3, 4  ;;  %s2753_s4 = int_to_ptr.vmem [resolvable:$true] %s2752_s4 }
 0xb4e   : > { %s2741_s28 = scalar_lea.hbm %s4875_s6, %s3123_s18  ;;  %s4291_s16 = smov 256  }
 0xb4f   : > { %p4896_p12 = scmp.ne.s32.totalorder %s4884_s9, 0  ;;  %s4292_s15 = smov 512  }
 0xb50   : > { %s4293_s20 = smov 2   ;;  %s4294_s29 = smov 128  }
 0xb51   : > { %3777 = sst [smem:[#allocation21]] (%p4896_p12), %s4291_s16  ;;  %s4295_s25 = smov 8  }
 0xb52   : > { %3778 = sst [smem:[#allocation21 + $0x1]] (%p4896_p12), %s4292_s15  ;;  %s4296_s19 = smov 131072  }
 0xb53   : > { %3779 = sst [smem:[#allocation21 + $0x2]] (%p4896_p12), %s4293_s20  ;;  %s4297_s12 = smov 0  }
 0xb54   : > { %3780 = sst [smem:[#allocation21 + $0x3]] (%p4896_p12), %s4294_s29 }
 0xb55   : > { %3781 = sst [smem:[#allocation21 + $0x4]] (%p4896_p12), %s4294_s29 }
 0xb56   : > { %3782 = sst [smem:[#allocation21 + $0x5]] (%p4896_p12), %s4295_s25 }
 0xb57   : > { %3783 = dma.general (%p4896_p12), %s2753_s4, 1536, %s2741_s28, %s2729_s26, %s4296_s19, [#allocation21], %s4297_s12, 0  }
 0xb58 PF: > { %s2780_s7 = sand.u32 1, %s4251_s21   ;;  %p4897_p8 = scmp.ne.s32.totalorder %s4885_s10, 0 }
 0xb59   : > { %s2781_s11 = scalar_lea.sflag [#allocation4], %s2780_s7 }
 0xb5a   : > { %p3796_p4 = pnand %p2915_p7, %p4897_p8 }
 0xb5c   : > { %p3797_p10 = pneg %p3796_p4 }
 0xb5e   : > { %4246 = dma.done.wait (%p3797_p10), %s2781_s11, 1536  }
 0xb5f   : > { %4248 = vsyncadd (%p3797_p10), %s2781_s11, 4294965760  ;;  %p24_p1 = scmp.ge.s32.totalorder %s4358_s27, 4   ;;  %s4898_s21 = smov %s4255_s22 }
 0xb60   : > { %s4899_s22 = smov %s4259_s23  ;;  %s4900_s23 = smov %s4370_s30 }
 0xb61   : > { %s4901_s24 = smov %s4358_s27  ;;  %26 = sbr.rel (!%p24_p1) target bundleno = 13 (0xd), region = 165 }
 0xb66   :  { %2786 = vsyncpa [#allocation3], 1 }
 0xb67   :  { %2788 = vsyncpa [#allocation3 + $0x1], 1 }
 0xb68   :  { %2789 = vsyncpa [#allocation6], 1 }
 0xb69   :  { %2791 = vsyncpa [#allocation6 + $0x1], 1 }
 0xb6a   :  { %2792 = vsyncpa [#allocation9], 1 }
 0xb6b   :  { %2793 = vsyncpa [#allocation12], 1 }
 0xb6c   :  { %2794 = vsyncpa [#allocation4], 1 }
 0xb6d   :  { %2796 = vsyncpa [#allocation4 + $0x1], 1 }

</bundles_post_ra>
